<compile_context>
chip_gen: v5e
topology: v5e:2x2
jax: 0.10.0
libtpu: 0.0.40
codegen_flags: <defaults>
</compile_context>

<pallas_src>
import functools

import numpy as np

import jax
import jax.numpy as jnp
from jax.experimental import pallas as pl
from jax.experimental.pallas import tpu as pltpu

INPUT_SIZE = 19
NUM_CLASSES = 2
POOL1_W = 10                        # width after conv1 + pool
POOL2_W = INPUT_SIZE // 4 + 2       # 6, width after conv2 + pool
FLAT_SIZE = 32 * 1 * POOL2_W        # 192
P1_ROWS = 16 * POOL1_W              # 160  (rows of pooled conv1, index = c*10 + w)
P2_ROWS = 32 * POOL2_W              # 192  (rows of pooled conv2, index = c*6 + w)
K1_PAD = 24                         # conv1 contraction dim padded 19 -> 24 (zeros)
NC_PAD = 8                          # fc output rows padded 2 -> 8 (unmasked store)


def cnn_kernel(x_ref, m1_ref, b1_ref, m2_ref, b2_ref, wf_ref, bf_ref, out_ref):
    """One batch block. x_ref: (K1_PAD, Bblk), out_ref: (NC_PAD, Bblk)."""
    f32 = jnp.float32

    def conv_relu_pool(m_ref, b_ref, data, rows):
        # m_ref rows are [q, pooled_row] with q = 2*h + d the 4 (conv-row,
        # pool-parity) candidates.  Bias is identical across q, so
        # max_q relu(z_q + b) == relu(max_q(z_q) + b): bias/ReLU applied once.
        acc = jnp.dot(m_ref[0:rows, :], data, preferred_element_type=f32)
        for q in range(1, 4):
            acc = jnp.maximum(
                acc,
                jnp.dot(m_ref[q * rows:(q + 1) * rows, :], data,
                        preferred_element_type=f32))
        return jnp.maximum(acc + b_ref[...], 0.0)

    x = x_ref[...]                                            # (24, Bblk), rows 19.. are 0
    p1 = conv_relu_pool(m1_ref, b1_ref, x, P1_ROWS)           # (160, Bblk)
    p2 = conv_relu_pool(m2_ref, b2_ref, p1, P2_ROWS)          # (192, Bblk)
    out_ref[...] = (jnp.dot(wf_ref[...], p2, preferred_element_type=f32)
                    + bf_ref[...])                            # (8, Bblk)


def _unroll_conv_stage(w_oihw, in_ch, in_w, out_w):
    """Unroll conv(3x3, pad=2, H==1 input) + ReLU + 2x2/2 pool into a dense matrix.

    Returns M of shape (4 * out_c * out_w, in_ch * in_w):
      row  = q * (out_c*out_w) + oc * out_w + w,  q = 2*h + d  (h: conv output row
             in {0,1} using kernel row kh = 2-h; d: pooled-column parity)
      col  = c_in * in_w + w_in
    Zero-padding of the width (pad=2) is encoded by dropping out-of-range taps.
    """
    out_c = w_oihw.shape[0]
    q = np.arange(4)
    h = q // 2
    d = q % 2
    kw = np.arange(3)
    w = np.arange(out_w)
    # input column read by candidate q at pooled column w, kernel tap kw
    wi = 2 * w[None, :, None] + d[:, None, None] + kw[None, None, :] - 2    # (4,ow,3)
    sel = (wi[..., None] == np.arange(in_w)).astype(np.float32)             # (4,ow,3,iw)
    sel = jnp.asarray(sel)
    # kernel row kh = 2 - h per candidate
    wq = jnp.stack([w_oihw[:, :, 2 - int(hh), :] for hh in h], axis=2)      # (oc,ic,4,3)
    m = jnp.einsum('ocqk,qwki->qowci', wq, sel)                             # (4,oc,ow,ic,iw)
    return m.reshape(4 * out_c * out_w, in_ch * in_w)


@functools.partial(jax.jit, static_argnames=("block_b",))
def cnn_forward(x, W1, b1, W2, b2, Wf, bf, *, block_b=128):
    """x: (B, 19) f32; parameters in PyTorch layouts (OIHW conv, (out,in) linear)."""
    B = x.shape[0]
    n_blocks = pl.cdiv(B, block_b)
    b_pad = n_blocks * block_b

    # ---- wrapper-side re-layout (layout plumbing only) ----
    # batch on lanes, conv1 contraction dim zero-padded 19 -> 24
    x_t = jnp.zeros((K1_PAD, b_pad), jnp.float32).at[:INPUT_SIZE, :B].set(
        x.astype(jnp.float32).T)

    m1 = _unroll_conv_stage(W1, 1, INPUT_SIZE, POOL1_W)                     # (640, 19)
    m1 = jnp.pad(m1, ((0, 0), (0, K1_PAD - INPUT_SIZE)))                    # (640, 24)
    m2 = _unroll_conv_stage(W2, 16, POOL1_W, POOL2_W)                       # (768, 160)
    b1r = jnp.repeat(b1, POOL1_W).reshape(P1_ROWS, 1)                       # (160, 1)
    b2r = jnp.repeat(b2, POOL2_W).reshape(P2_ROWS, 1)                       # (192, 1)
    # fc flat index is c*6 + w, exactly the row order of p2 -> use Wf directly.
    wf8 = jnp.zeros((NC_PAD, FLAT_SIZE), jnp.float32).at[:NUM_CLASSES].set(Wf)
    bf8 = jnp.zeros((NC_PAD, 1), jnp.float32).at[:NUM_CLASSES, 0].set(bf)

    out = pl.pallas_call(
        cnn_kernel,
        out_shape=jax.ShapeDtypeStruct((NC_PAD, b_pad), jnp.float32),
        grid=(n_blocks,),
        in_specs=[
            pl.BlockSpec((K1_PAD, block_b), lambda i: (0, i)),    # x: blocked on batch
            pl.BlockSpec(m1.shape, lambda i: (0, 0)),             # weights: VMEM-resident
            pl.BlockSpec(b1r.shape, lambda i: (0, 0)),
            pl.BlockSpec(m2.shape, lambda i: (0, 0)),
            pl.BlockSpec(b2r.shape, lambda i: (0, 0)),
            pl.BlockSpec(wf8.shape, lambda i: (0, 0)),
            pl.BlockSpec(bf8.shape, lambda i: (0, 0)),
        ],
        out_specs=pl.BlockSpec((NC_PAD, block_b), lambda i: (0, i)),
        compiler_params=pltpu.CompilerParams(
            dimension_semantics=("parallel",)),                   # megacore on v7x
    )(x_t, m1, b1r, m2, b2r, wf8, bf8)

    return out[:NUM_CLASSES, :B].T                                # (B, 2)


def ref_forward(x, W1, b1, W2, b2, Wf, bf):
    """Pure-JAX NCHW reference matching the PyTorch module."""
    hp = "highest"
    y = x[:, None, None, :]                                            # (B,1,1,19)
    y = jax.lax.conv_general_dilated(y, W1, (1, 1), ((2, 2), (2, 2)),
                                     dimension_numbers=("NCHW", "OIHW", "NCHW"),
                                     precision=hp)
    y = jax.nn.relu(y + b1[None, :, None, None])
    y = jax.lax.reduce_window(y, -jnp.inf, jax.lax.max,
                              (1, 1, 2, 2), (1, 1, 2, 2), "VALID")
    y = jax.lax.conv_general_dilated(y, W2, (1, 1), ((2, 2), (2, 2)),
                                     dimension_numbers=("NCHW", "OIHW", "NCHW"),
                                     precision=hp)
    y = jax.nn.relu(y + b2[None, :, None, None])
    y = jax.lax.reduce_window(y, -jnp.inf, jax.lax.max,
                              (1, 1, 2, 2), (1, 1, 2, 2), "VALID")
    flat = y.reshape(y.shape[0], -1)                                   # (B, 192)
    return jnp.dot(flat, Wf.T, precision=hp) + bf


if __name__ == "__main__":
    key = jax.random.PRNGKey(0)
    ks = jax.random.split(key, 8)
    B = 4
    x = jax.random.normal(ks[0], (B, INPUT_SIZE), dtype=jnp.float32)

    # Deterministic synthetic parameters (shapes from the module's __init__).
    W1 = 0.2 * jax.random.normal(ks[1], (16, 1, 3, 3), dtype=jnp.float32)
    b1 = 0.1 * jax.random.normal(ks[2], (16,), dtype=jnp.float32)
    W2 = 0.1 * jax.random.normal(ks[3], (32, 16, 3, 3), dtype=jnp.float32)
    b2 = 0.1 * jax.random.normal(ks[4], (32,), dtype=jnp.float32)
    Wf = 0.1 * jax.random.normal(ks[5], (NUM_CLASSES, FLAT_SIZE), dtype=jnp.float32)
    bf = 0.1 * jax.random.normal(ks[6], (NUM_CLASSES,), dtype=jnp.float32)

    out = cnn_forward(x, W1, b1, W2, b2, Wf, bf)
    out = jax.block_until_ready(out)

    ref = ref_forward(x, W1, b1, W2, b2, Wf, bf)
    assert out.shape == (B, NUM_CLASSES)
    # Tightened from the previous 1e-2; residual slack only covers MXU
    # accumulation-order differences vs. the XLA conv reference.
    assert jnp.allclose(out, ref, atol=5e-3, rtol=5e-3), (out, ref)
    print("KERNEL_OK")
</pallas_src>

<mosaic_0001>
module attributes {stable_mosaic.version = 11 : i64} {
  func.func @cnn_kernel(%arg0: i32, %arg1: memref<24x128xf32, #tpu.memory_space<vmem>>, %arg2: memref<640x24xf32, #tpu.memory_space<vmem>>, %arg3: memref<160x1xf32, #tpu.memory_space<vmem>>, %arg4: memref<768x160xf32, #tpu.memory_space<vmem>>, %arg5: memref<192x1xf32, #tpu.memory_space<vmem>>, %arg6: memref<8x192xf32, #tpu.memory_space<vmem>>, %arg7: memref<8x1xf32, #tpu.memory_space<vmem>>, %arg8: memref<8x128xf32, #tpu.memory_space<vmem>>) attributes {dimension_semantics = [#tpu.dimension_semantics<parallel>], iteration_bounds = array<i64: 1>, scalar_prefetch = 0 : i64, scratch_operands = 0 : i64, tpu.core_type = #tpu.core_type<tc>, window_params = [{transform_indices = @transform_0, window_bounds = array<i64: 24, 128>}, {pipeline_mode = #tpu.pipeline_mode<synchronous>, transform_indices = @transform_1, window_bounds = array<i64: 640, 24>}, {pipeline_mode = #tpu.pipeline_mode<synchronous>, transform_indices = @transform_2, window_bounds = array<i64: 160, 1>}, {pipeline_mode = #tpu.pipeline_mode<synchronous>, transform_indices = @transform_3, window_bounds = array<i64: 768, 160>}, {pipeline_mode = #tpu.pipeline_mode<synchronous>, transform_indices = @transform_4, window_bounds = array<i64: 192, 1>}, {pipeline_mode = #tpu.pipeline_mode<synchronous>, transform_indices = @transform_5, window_bounds = array<i64: 8, 192>}, {pipeline_mode = #tpu.pipeline_mode<synchronous>, transform_indices = @transform_6, window_bounds = array<i64: 8, 1>}, {transform_indices = @transform_7, window_bounds = array<i64: 8, 128>}]} {
    %c0 = arith.constant 0 : index
    %c0_0 = arith.constant 0 : index
    %0 = vector.load %arg1[%c0, %c0_0] : memref<24x128xf32, #tpu.memory_space<vmem>>, vector<24x128xf32>
    %c0_1 = arith.constant 0 : index
    %c0_2 = arith.constant 0 : index
    %1 = vector.load %arg2[%c0_1, %c0_2] : memref<640x24xf32, #tpu.memory_space<vmem>>, vector<160x24xf32>
    %cst = arith.constant dense<0.000000e+00> : vector<160x128xf32>
    %2 = tpu.matmul %1, %0, %cst {dimension_numbers = #tpu.dot_dimension_numbers<[1], [0], [0], [1], [0, 0, 1, 1], [], []>} : vector<160x24xf32>, vector<24x128xf32>, vector<160x128xf32> -> vector<160x128xf32>
    %c160 = arith.constant 160 : index
    %c0_3 = arith.constant 0 : index
    %3 = vector.load %arg2[%c160, %c0_3] : memref<640x24xf32, #tpu.memory_space<vmem>>, vector<160x24xf32>
    %cst_4 = arith.constant dense<0.000000e+00> : vector<160x128xf32>
    %4 = tpu.matmul %3, %0, %cst_4 {dimension_numbers = #tpu.dot_dimension_numbers<[1], [0], [0], [1], [0, 0, 1, 1], [], []>} : vector<160x24xf32>, vector<24x128xf32>, vector<160x128xf32> -> vector<160x128xf32>
    %5 = arith.maximumf %2, %4 : vector<160x128xf32>
    %c320 = arith.constant 320 : index
    %c0_5 = arith.constant 0 : index
    %6 = vector.load %arg2[%c320, %c0_5] : memref<640x24xf32, #tpu.memory_space<vmem>>, vector<160x24xf32>
    %cst_6 = arith.constant dense<0.000000e+00> : vector<160x128xf32>
    %7 = tpu.matmul %6, %0, %cst_6 {dimension_numbers = #tpu.dot_dimension_numbers<[1], [0], [0], [1], [0, 0, 1, 1], [], []>} : vector<160x24xf32>, vector<24x128xf32>, vector<160x128xf32> -> vector<160x128xf32>
    %8 = arith.maximumf %5, %7 : vector<160x128xf32>
    %c480 = arith.constant 480 : index
    %c0_7 = arith.constant 0 : index
    %9 = vector.load %arg2[%c480, %c0_7] : memref<640x24xf32, #tpu.memory_space<vmem>>, vector<160x24xf32>
    %cst_8 = arith.constant dense<0.000000e+00> : vector<160x128xf32>
    %10 = tpu.matmul %9, %0, %cst_8 {dimension_numbers = #tpu.dot_dimension_numbers<[1], [0], [0], [1], [0, 0, 1, 1], [], []>} : vector<160x24xf32>, vector<24x128xf32>, vector<160x128xf32> -> vector<160x128xf32>
    %11 = arith.maximumf %8, %10 : vector<160x128xf32>
    %c0_9 = arith.constant 0 : index
    %c0_10 = arith.constant 0 : index
    %12 = vector.load %arg3[%c0_9, %c0_10] : memref<160x1xf32, #tpu.memory_space<vmem>>, vector<160x1xf32>
    %13 = vector.broadcast %12 : vector<160x1xf32> to vector<160x128xf32>
    %14 = arith.addf %11, %13 : vector<160x128xf32>
    %cst_11 = arith.constant 0.000000e+00 : f32
    %15 = vector.broadcast %cst_11 : f32 to vector<160x128xf32>
    %16 = arith.maximumf %14, %15 : vector<160x128xf32>
    %c0_12 = arith.constant 0 : index
    %c0_13 = arith.constant 0 : index
    %17 = vector.load %arg4[%c0_12, %c0_13] : memref<768x160xf32, #tpu.memory_space<vmem>>, vector<192x160xf32>
    %cst_14 = arith.constant dense<0.000000e+00> : vector<192x128xf32>
    %18 = tpu.matmul %17, %16, %cst_14 {dimension_numbers = #tpu.dot_dimension_numbers<[1], [0], [0], [1], [0, 0, 1, 1], [], []>} : vector<192x160xf32>, vector<160x128xf32>, vector<192x128xf32> -> vector<192x128xf32>
    %c192 = arith.constant 192 : index
    %c0_15 = arith.constant 0 : index
    %19 = vector.load %arg4[%c192, %c0_15] : memref<768x160xf32, #tpu.memory_space<vmem>>, vector<192x160xf32>
    %cst_16 = arith.constant dense<0.000000e+00> : vector<192x128xf32>
    %20 = tpu.matmul %19, %16, %cst_16 {dimension_numbers = #tpu.dot_dimension_numbers<[1], [0], [0], [1], [0, 0, 1, 1], [], []>} : vector<192x160xf32>, vector<160x128xf32>, vector<192x128xf32> -> vector<192x128xf32>
    %21 = arith.maximumf %18, %20 : vector<192x128xf32>
    %c384 = arith.constant 384 : index
    %c0_17 = arith.constant 0 : index
    %22 = vector.load %arg4[%c384, %c0_17] : memref<768x160xf32, #tpu.memory_space<vmem>>, vector<192x160xf32>
    %cst_18 = arith.constant dense<0.000000e+00> : vector<192x128xf32>
    %23 = tpu.matmul %22, %16, %cst_18 {dimension_numbers = #tpu.dot_dimension_numbers<[1], [0], [0], [1], [0, 0, 1, 1], [], []>} : vector<192x160xf32>, vector<160x128xf32>, vector<192x128xf32> -> vector<192x128xf32>
    %24 = arith.maximumf %21, %23 : vector<192x128xf32>
    %c576 = arith.constant 576 : index
    %c0_19 = arith.constant 0 : index
    %25 = vector.load %arg4[%c576, %c0_19] : memref<768x160xf32, #tpu.memory_space<vmem>>, vector<192x160xf32>
    %cst_20 = arith.constant dense<0.000000e+00> : vector<192x128xf32>
    %26 = tpu.matmul %25, %16, %cst_20 {dimension_numbers = #tpu.dot_dimension_numbers<[1], [0], [0], [1], [0, 0, 1, 1], [], []>} : vector<192x160xf32>, vector<160x128xf32>, vector<192x128xf32> -> vector<192x128xf32>
    %27 = arith.maximumf %24, %26 : vector<192x128xf32>
    %c0_21 = arith.constant 0 : index
    %c0_22 = arith.constant 0 : index
    %28 = vector.load %arg5[%c0_21, %c0_22] : memref<192x1xf32, #tpu.memory_space<vmem>>, vector<192x1xf32>
    %29 = vector.broadcast %28 : vector<192x1xf32> to vector<192x128xf32>
    %30 = arith.addf %27, %29 : vector<192x128xf32>
    %cst_23 = arith.constant 0.000000e+00 : f32
    %31 = vector.broadcast %cst_23 : f32 to vector<192x128xf32>
    %32 = arith.maximumf %30, %31 : vector<192x128xf32>
    %c0_24 = arith.constant 0 : index
    %c0_25 = arith.constant 0 : index
    %33 = vector.load %arg6[%c0_24, %c0_25] : memref<8x192xf32, #tpu.memory_space<vmem>>, vector<8x192xf32>
    %cst_26 = arith.constant dense<0.000000e+00> : vector<8x128xf32>
    %34 = tpu.matmul %33, %32, %cst_26 {dimension_numbers = #tpu.dot_dimension_numbers<[1], [0], [0], [1], [0, 0, 1, 1], [], []>} : vector<8x192xf32>, vector<192x128xf32>, vector<8x128xf32> -> vector<8x128xf32>
    %c0_27 = arith.constant 0 : index
    %c0_28 = arith.constant 0 : index
    %35 = vector.load %arg7[%c0_27, %c0_28] : memref<8x1xf32, #tpu.memory_space<vmem>>, vector<8x1xf32>
    %36 = vector.broadcast %35 : vector<8x1xf32> to vector<8x128xf32>
    %37 = arith.addf %34, %36 : vector<8x128xf32>
    %c0_29 = arith.constant 0 : index
    %c0_30 = arith.constant 0 : index
    %38 = vector.load %arg8[%c0_29, %c0_30] : memref<8x128xf32, #tpu.memory_space<vmem>>, vector<8x128xf32>
    tpu.vector_store %arg8[%c0_29, %c0_30], %37 {strides = array<i32>} : memref<8x128xf32, #tpu.memory_space<vmem>>, vector<8x128xf32>,
    return
  }
  func.func @transform_0(%arg0: i32) -> (i32, i32) {
    %c0_i32 = arith.constant 0 : i32
    %c0_i32_0 = arith.constant 0 : i32
    return %c0_i32, %arg0 : i32, i32
  }
  func.func @transform_1(%arg0: i32) -> (i32, i32) {
    %c0_i32 = arith.constant 0 : i32
    %c0_i32_0 = arith.constant 0 : i32
    %c0_i32_1 = arith.constant 0 : i32
    return %c0_i32, %c0_i32_0 : i32, i32
  }
  func.func @transform_2(%arg0: i32) -> (i32, i32) {
    %c0_i32 = arith.constant 0 : i32
    %c0_i32_0 = arith.constant 0 : i32
    %c0_i32_1 = arith.constant 0 : i32
    return %c0_i32, %c0_i32_0 : i32, i32
  }
  func.func @transform_3(%arg0: i32) -> (i32, i32) {
    %c0_i32 = arith.constant 0 : i32
    %c0_i32_0 = arith.constant 0 : i32
    %c0_i32_1 = arith.constant 0 : i32
    return %c0_i32, %c0_i32_0 : i32, i32
  }
  func.func @transform_4(%arg0: i32) -> (i32, i32) {
    %c0_i32 = arith.constant 0 : i32
    %c0_i32_0 = arith.constant 0 : i32
    %c0_i32_1 = arith.constant 0 : i32
    return %c0_i32, %c0_i32_0 : i32, i32
  }
  func.func @transform_5(%arg0: i32) -> (i32, i32) {
    %c0_i32 = arith.constant 0 : i32
    %c0_i32_0 = arith.constant 0 : i32
    %c0_i32_1 = arith.constant 0 : i32
    return %c0_i32, %c0_i32_0 : i32, i32
  }
  func.func @transform_6(%arg0: i32) -> (i32, i32) {
    %c0_i32 = arith.constant 0 : i32
    %c0_i32_0 = arith.constant 0 : i32
    %c0_i32_1 = arith.constant 0 : i32
    return %c0_i32, %c0_i32_0 : i32, i32
  }
  func.func @transform_7(%arg0: i32) -> (i32, i32) {
    %c0_i32 = arith.constant 0 : i32
    %c0_i32_0 = arith.constant 0 : i32
    return %c0_i32, %arg0 : i32, i32
  }
}

</mosaic_0001>

<bundles_post_ra>
// kernel: cnn_forward.1
= control target key start
LH: loop header
LB: loop body
LE: loop exit
PB: predicated region body
PF: predicated region fallthrough
CT: control target
= control target key end

     0   :  { %v2573_v0 = vmov 0   ;;  %vm49_vm0 = vcmask 195584   ;;  %vm926_vm1 = vcmask 261120   ;;  %vm2343_vm2 = vcmask 523264   ;;  %s4419_s2 = inlined_call_operand.vmem [shape: f32[160,1], index: 2, kind: input, shape index: {}]   ;;  %s4420_s0 = inlined_call_operand.vmem [shape: f32[24,128], index: 0, kind: input, shape index: {}]   ;;  %s4421_s1 = inlined_call_operand.vmem [shape: f32[640,24], index: 1, kind: input, shape index: {}]   ;;  %s4422_s4 = inlined_call_operand.vmem [shape: f32[192,1], index: 4, kind: input, shape index: {}]   ;;  %s4423_s6 = inlined_call_operand.vmem [shape: f32[8,1], index: 6, kind: input, shape index: {}]   ;;  %s4424_s3 = inlined_call_operand.vmem [shape: f32[768,160], index: 3, kind: input, shape index: {}]   ;;  %s4425_s5 = inlined_call_operand.vmem [shape: f32[8,192], index: 5, kind: input, shape index: {}]   ;;  %s4426_s7 = inlined_call_operand.vmem [shape: f32[8,128], index: 7, kind: output, shape index: {}]  }
   0x1   :  { %2571 = vset.pattern.permute.xlu1 %v2573_v0  ;;  %2570 = vset.pattern.permute.xlu0 %v2573_v0  ;;  %v733_v1 = vld [vmem:[%s4419_s2 + $0x78] sm:$0xff]  ;;  %v731_v2 = vld [vmem:[%s4419_s2 + $0x68] sm:$0xff]  ;;  %v28_v3 = vld [vmem:[%s4420_s0 + $0x10] sm:$0xff] }
   0x2   :  { %815 = vperm.xlu0 %2570, %v733_v1   ;;  %805 = vperm.xlu1 %2571, %v731_v2   ;;  %v27_v4 = vld [vmem:[%s4420_s0 + $0x8] sm:$0xff]  ;;  %v26_v5 = vld [vmem:[%s4420_s0] sm:$0xff]  ;;  %v732_v8 = vld [vmem:[%s4419_s2 + $0x70] sm:$0xff] }
   0x3   :  { %457 = vmatpush.msra.mxu2 %v28_v3  ;;  %634 = vmatpush.msra.mxu3 %v28_v3  ;;  %v364_v6 = vld [vmem:[%s4421_s1 + $0x140] sm:$0xff]  ;;  %v729_v12 = vld [vmem:[%s4419_s2 + $0x58] sm:$0xff]  ;;  %v365_v13 = vld [vmem:[%s4421_s1 + $0x148] sm:$0xff] }
   0x4   :  { %123 = vmatpush.msra.mxu0 %v28_v3  ;;  %280 = vmatpush.msra.mxu1 %v28_v3  ;;  %v541_v7 = vld [vmem:[%s4421_s1 + $0x1e0] sm:$0xff]  ;;  %v542_v14 = vld [vmem:[%s4421_s1 + $0x1e8] sm:$0xff]  ;;  %v728_v19 = vld [vmem:[%s4419_s2 + $0x50] sm:$0xff] }
   0x5   :  { %458 = vmatpush.msra.mxu2 %v27_v4  ;;  %635 = vmatpush.msra.mxu3 %v27_v4  ;;  %v730_v9 = vld [vmem:[%s4419_s2 + $0x60] sm:$0xff]  ;;  %v727_v15 = vld [vmem:[%s4419_s2 + $0x48] sm:$0xff]  ;;  %v366_v20 = vld [vmem:[%s4421_s1 + $0x150] sm:$0xff] }
   0x6   :  { %124 = vmatpush.msra.mxu0 %v27_v4  ;;  %281 = vmatpush.msra.mxu1 %v27_v4  ;;  %v29_v10 = vld [vmem:[%s4421_s1] sm:$0xff]  ;;  %v30_v17 = vld [vmem:[%s4421_s1 + $0x8] sm:$0xff]  ;;  %v543_v21 = vld [vmem:[%s4421_s1 + $0x1f0] sm:$0xff] }
   0x7   :  { %459 = vmatpush.msra.mxu2 %v26_v5  ;;  %636 = vmatpush.msra.mxu3 %v26_v5  ;;  %v187_v11 = vld [vmem:[%s4421_s1 + $0xa0] sm:$0xff]  ;;  %v188_v18 = vld [vmem:[%s4421_s1 + $0xa8] sm:$0xff]  ;;  %v724_v22 = vld [vmem:[%s4419_s2 + $0x30] sm:$0xff] }
   0x8   :  { %2432 = vmatmul.msk.f32.vlgmr.msra.gmra.mxu2 %vm49_vm0, %v364_v6  ;;  %2452 = vmatmul.msk.f32.vlgmr.msra.gmra.mxu3 %vm49_vm0, %v541_v7  ;;  %v726_v16 = vld [vmem:[%s4419_s2 + $0x40] sm:$0xff]  ;;  %v723_v23 = vld [vmem:[%s4419_s2 + $0x28] sm:$0xff]  ;;  %v31_v24 = vld [vmem:[%s4421_s1 + $0x10] sm:$0xff] }
   0x9   :  { %125 = vmatpush.msra.mxu0 %v26_v5  ;;  %282 = vmatpush.msra.mxu1 %v26_v5  ;;  %v189_v25 = vld [vmem:[%s4421_s1 + $0xb0] sm:$0xff]  ;;  %v725_v26 = vld [vmem:[%s4419_s2 + $0x38] sm:$0xff]  ;;  %v722_v33 = vld [vmem:[%s4419_s2 + $0x20] sm:$0xff] }
   0xa   :  { %810 = vperm.xlu0 %2570, %v732_v8   ;;  %800 = vperm.xlu1 %2571, %v730_v9   ;;  %v367_v27 = vld [vmem:[%s4421_s1 + $0x158] sm:$0xff]  ;;  %v368_v34 = vld [vmem:[%s4421_s1 + $0x160] sm:$0xff]  ;;  %v736_v36 = vld [vmem:[%s4419_s2 + $0x90] sm:$0xff] }
   0xb   :  { %2392 = vmatmul.msk.f32.vlgmr.msra.gmra.mxu0 %vm49_vm0, %v29_v10  ;;  %2412 = vmatmul.msk.f32.vlgmr.msra.gmra.mxu1 %vm49_vm0, %v187_v11  ;;  %v544_v28 = vld [vmem:[%s4421_s1 + $0x1f8] sm:$0xff]  ;;  %v545_v35 = vld [vmem:[%s4421_s1 + $0x200] sm:$0xff]  ;;  %v719_v37 = vld [vmem:[%s4419_s2 + $0x8] sm:$0xff] }
   0xc   :  { %2572 = vset.pattern.permute.xlu2 %v2573_v0  ;;  %v737_v29 = vld [vmem:[%s4419_s2 + $0x98] sm:$0xff]  ;;  %v33_v38 = vld [vmem:[%s4421_s1 + $0x20] sm:$0xff]  ;;  %v720_v40 = vld [vmem:[%s4419_s2 + $0x10] sm:$0xff] }
   0xd   :  { %795 = vperm.xlu2 %2572, %v729_v12   ;;  %v721_v30 = vld [vmem:[%s4419_s2 + $0x18] sm:$0xff]  ;;  %v191_v39 = vld [vmem:[%s4421_s1 + $0xc0] sm:$0xff]  ;;  %v369_v41 = vld [vmem:[%s4421_s1 + $0x168] sm:$0xff] }
   0xe   :  { %v32_v31 = vld [vmem:[%s4421_s1 + $0x18] sm:$0xff]  ;;  %v546_v42 = vld [vmem:[%s4421_s1 + $0x208] sm:$0xff]  ;;  %v718_v43 = vld [vmem:[%s4419_s2] sm:$0xff] }
   0xf   :  { %v190_v32 = vld [vmem:[%s4421_s1 + $0xb8] sm:$0xff]  ;;  %v734_v44 = vld [vmem:[%s4419_s2 + $0x80] sm:$0xff]  ;;  %v34_v45 = vld [vmem:[%s4421_s1 + $0x28] sm:$0xff] }
  0x10   :  { %2433 = vmatmul.msk.f32.gmra.mxu2 %vm49_vm0, %v365_v13  ;;  %2453 = vmatmul.msk.f32.gmra.mxu3 %vm49_vm0, %v542_v14  ;;  %v192_v46 = vld [vmem:[%s4421_s1 + $0xc8] sm:$0xff]  ;;  %v370_v47 = vld [vmem:[%s4421_s1 + $0x170] sm:$0xff]  ;;  %v371_v53 = vld [vmem:[%s4421_s1 + $0x178] sm:$0xff] }
  0x11   :  { %v547_v48 = vld [vmem:[%s4421_s1 + $0x210] sm:$0xff]  ;;  %v2156_v49 = vld [vmem:[%s4422_s4 + $0x68] sm:$0xff]  ;;  %v548_v54 = vld [vmem:[%s4421_s1 + $0x218] sm:$0xff] }
  0x12   :  { %785 = vperm.xlu0 %2570, %v727_v15   ;;  %780 = vperm.xlu1 %2571, %v726_v16   ;;  %v2157_v50 = vld [vmem:[%s4422_s4 + $0x70] sm:$0xff]  ;;  %v2154_v56 = vld [vmem:[%s4422_s4 + $0x58] sm:$0xff]  ;;  %v735_v59 = vld [vmem:[%s4419_s2 + $0x88] sm:$0xff] }
  0x13   :  { %2393 = vmatmul.msk.f32.gmra.mxu0 %vm49_vm0, %v30_v17  ;;  %2413 = vmatmul.msk.f32.gmra.mxu1 %vm49_vm0, %v188_v18  ;;  %v35_v51 = vld [vmem:[%s4421_s1 + $0x30] sm:$0xff]  ;;  %v36_v57 = vld [vmem:[%s4421_s1 + $0x38] sm:$0xff]  ;;  %v372_v60 = vld [vmem:[%s4421_s1 + $0x180] sm:$0xff] }
  0x14   :  { %v193_v52 = vld [vmem:[%s4421_s1 + $0xd0] sm:$0xff]  ;;  %v194_v58 = vld [vmem:[%s4421_s1 + $0xd8] sm:$0xff]  ;;  %v549_v61 = vld [vmem:[%s4421_s1 + $0x220] sm:$0xff] }
  0x15   :  { %790 = vperm.xlu2 %2572, %v728_v19   ;;  %v2153_v55 = vld [vmem:[%s4422_s4 + $0x50] sm:$0xff]  ;;  %v2150_v62 = vld [vmem:[%s4422_s4 + $0x38] sm:$0xff]  ;;  %v2151_v63 = vld [vmem:[%s4422_s4 + $0x40] sm:$0xff] }
  0x16   :  { %v37_v0 = vld [vmem:[%s4421_s1 + $0x40] sm:$0xff]  ;;  %v2158_v2 = vld [vmem:[%s4422_s4 + $0x78] sm:$0xff]  ;;  %v373_v3 = vld [vmem:[%s4421_s1 + $0x188] sm:$0xff] }
  0x17   :  { %v195_v1 = vld [vmem:[%s4421_s1 + $0xe0] sm:$0xff]  ;;  %v550_v4 = vld [vmem:[%s4421_s1 + $0x228] sm:$0xff]  ;;  %v2166_v6 = vld [vmem:[%s4422_s4 + $0xb8] sm:$0xff] }
  0x18   :  { %2434 = vmatmul.msk.f32.gmra.mxu2 %vm49_vm0, %v366_v20  ;;  %2454 = vmatmul.msk.f32.gmra.mxu3 %vm49_vm0, %v543_v21  ;;  %v2148_v5 = vld [vmem:[%s4422_s4 + $0x28] sm:$0xff]  ;;  %v2155_v9 = vld [vmem:[%s4422_s4 + $0x60] sm:$0xff]  ;;  %v374_v10 = vld [vmem:[%s4421_s1 + $0x190] sm:$0xff] }
  0x19   :  { %v38_v7 = vld [vmem:[%s4421_s1 + $0x48] sm:$0xff]  ;;  %v551_v11 = vld [vmem:[%s4421_s1 + $0x230] sm:$0xff]  ;;  %v2147_v13 = vld [vmem:[%s4422_s4 + $0x20] sm:$0xff] }
  0x1a   :  { %770 = vperm.xlu0 %2570, %v724_v22   ;;  %765 = vperm.xlu1 %2571, %v723_v23   ;;  %v196_v8 = vld [vmem:[%s4421_s1 + $0xe8] sm:$0xff]  ;;  %v39_v14 = vld [vmem:[%s4421_s1 + $0x50] sm:$0xff]  ;;  %v375_v17 = vld [vmem:[%s4421_s1 + $0x198] sm:$0xff] }
  0x1b   :  { %2394 = vmatmul.msk.f32.gmra.mxu0 %vm49_vm0, %v31_v24  ;;  %2414 = vmatmul.msk.f32.gmra.mxu1 %vm49_vm0, %v189_v25  ;;  %v2164_v12 = vld [vmem:[%s4422_s4 + $0xa8] sm:$0xff]  ;;  %v197_v15 = vld [vmem:[%s4421_s1 + $0xf0] sm:$0xff]  ;;  %v552_v18 = vld [vmem:[%s4421_s1 + $0x238] sm:$0xff] }
  0x1c   :  { %v2152_v16 = vld [vmem:[%s4422_s4 + $0x48] sm:$0xff]  ;;  %v2145_v19 = vld [vmem:[%s4422_s4 + $0x10] sm:$0xff]  ;;  %v2163_v20 = vld [vmem:[%s4422_s4 + $0xa0] sm:$0xff] }
  0x1d   :  { %775 = vperm.xlu2 %2572, %v725_v26   ;;  %v40_v21 = vld [vmem:[%s4421_s1 + $0x58] sm:$0xff]  ;;  %v2149_v23 = vld [vmem:[%s4422_s4 + $0x30] sm:$0xff]  ;;  %v376_v24 = vld [vmem:[%s4421_s1 + $0x1a0] sm:$0xff] }
  0x1e   :  { %v198_v22 = vld [vmem:[%s4421_s1 + $0xf8] sm:$0xff]  ;;  %v553_v25 = vld [vmem:[%s4421_s1 + $0x240] sm:$0xff]  ;;  %v2161_v26 = vld [vmem:[%s4422_s4 + $0x90] sm:$0xff] }
  0x20   :  { %2435 = vmatmul.msk.f32.gmra.mxu2 %vm49_vm0, %v367_v27  ;;  %2455 = vmatmul.msk.f32.gmra.mxu3 %vm49_vm0, %v544_v28  ;;  %v2144_v27 = vld [vmem:[%s4422_s4 + $0x8] sm:$0xff]  ;;  %v41_v28 = vld [vmem:[%s4421_s1 + $0x60] sm:$0xff] }
  0x22   :  { %835 = vperm.xlu1 %2571, %v737_v29   ;;  %755 = vperm.xlu0 %2570, %v721_v30   ;;  %v199_v29 = vld [vmem:[%s4421_s1 + $0x100] sm:$0xff]  ;;  %v2165_v30 = vld [vmem:[%s4422_s4 + $0xb0] sm:$0xff] }
  0x23   :  { %2395 = vmatmul.msk.f32.gmra.mxu0 %vm49_vm0, %v32_v31  ;;  %2415 = vmatmul.msk.f32.gmra.mxu1 %vm49_vm0, %v190_v32  ;;  %v377_v31 = vld [vmem:[%s4421_s1 + $0x1a8] sm:$0xff] }
  0x24   :  { %v554_v32 = vld [vmem:[%s4421_s1 + $0x248] sm:$0xff] }
  0x25   :  { %760 = vperm.xlu2 %2572, %v722_v33   ;;  %v2159_v33 = vld [vmem:[%s4422_s4 + $0x80] sm:$0xff] }
  0x28   :  { %2436 = vmatmul.msk.f32.gmra.mxu2 %vm49_vm0, %v368_v34  ;;  %2456 = vmatmul.msk.f32.gmra.mxu3 %vm49_vm0, %v545_v35  ;;  %v2160_v34 = vld [vmem:[%s4422_s4 + $0x88] sm:$0xff] }
  0x29   :  { %v42_v35 = vld [vmem:[%s4421_s1 + $0x68] sm:$0xff] }
  0x2a   :  { %830 = vperm.xlu0 %2570, %v736_v36   ;;  %745 = vperm.xlu1 %2571, %v719_v37   ;;  %v200_v36 = vld [vmem:[%s4421_s1 + $0x108] sm:$0xff]  ;;  %v2146_v37 = vld [vmem:[%s4422_s4 + $0x18] sm:$0xff] }
  0x2b   :  { %2396 = vmatmul.msk.f32.gmra.mxu0 %vm49_vm0, %v33_v38  ;;  %2416 = vmatmul.msk.f32.gmra.mxu1 %vm49_vm0, %v191_v39  ;;  %v378_v38 = vld [vmem:[%s4421_s1 + $0x1b0] sm:$0xff] }
  0x2c   :  { %v555_v39 = vld [vmem:[%s4421_s1 + $0x250] sm:$0xff] }
  0x2d   :  { %750 = vperm.xlu2 %2572, %v720_v40   ;;  %v43_v40 = vld [vmem:[%s4421_s1 + $0x70] sm:$0xff] }
  0x30   :  { %2437 = vmatmul.msk.f32.gmra.mxu2 %vm49_vm0, %v369_v41  ;;  %2457 = vmatmul.msk.f32.gmra.mxu3 %vm49_vm0, %v546_v42  ;;  %v201_v41 = vld [vmem:[%s4421_s1 + $0x110] sm:$0xff]  ;;  %v2162_v42 = vld [vmem:[%s4422_s4 + $0x98] sm:$0xff] }
  0x32   :  { %740 = vperm.xlu0 %2570, %v718_v43   ;;  %820 = vperm.xlu1 %2571, %v734_v44   ;;  %v379_v43 = vld [vmem:[%s4421_s1 + $0x1b8] sm:$0xff] }
  0x33   :  { %2397 = vmatmul.msk.f32.gmra.mxu0 %vm49_vm0, %v34_v45  ;;  %2417 = vmatmul.msk.f32.gmra.mxu1 %vm49_vm0, %v192_v46  ;;  %v556_v44 = vld [vmem:[%s4421_s1 + $0x258] sm:$0xff] }
  0x34   :  { %v44_v45 = vld [vmem:[%s4421_s1 + $0x78] sm:$0xff] }
  0x35   :  { %825 = vperm.xlu2 %2572, %v735_v59   ;;  %v202_v46 = vld [vmem:[%s4421_s1 + $0x118] sm:$0xff] }
  0x38   :  { %2438 = vmatmul.msk.f32.gmra.mxu2 %vm49_vm0, %v370_v47  ;;  %2458 = vmatmul.msk.f32.gmra.mxu3 %vm49_vm0, %v547_v48  ;;  %v2143_v47 = vld [vmem:[%s4422_s4] sm:$0xff] }
  0x39   :  { %v380_v48 = vld [vmem:[%s4421_s1 + $0x1c0] sm:$0xff] }
  0x3a   :  { %2234 = vperm.xlu1 %2571, %v2156_v49   ;;  %2239 = vperm.xlu0 %2570, %v2157_v50   ;;  %v557_v49 = vld [vmem:[%s4421_s1 + $0x260] sm:$0xff] }
  0x3b   :  { %2398 = vmatmul.msk.f32.gmra.mxu0 %vm49_vm0, %v35_v51  ;;  %2418 = vmatmul.msk.f32.gmra.mxu1 %vm49_vm0, %v193_v52  ;;  %v45_v52 = vld [vmem:[%s4421_s1 + $0x80] sm:$0xff] }
  0x3d   :  { %2244 = vperm.xlu2 %2572, %v2158_v2   ;;  %v559_v2 = vld [vmem:[%s4421_s1 + $0x270] sm:$0xff] }
  0x40   :  { %2439 = vmatmul.msk.f32.gmra.mxu2 %vm49_vm0, %v371_v53  ;;  %2459 = vmatmul.msk.f32.gmra.mxu3 %vm49_vm0, %v548_v54  ;;  %v203_v53 = vld [vmem:[%s4421_s1 + $0x120] sm:$0xff] }
  0x41   :  { %v2337_v54 = vld [vmem:[%s4423_s6] sm:$0xff] }
  0x42   :  { %2219 = vperm.xlu1 %2571, %v2153_v55   ;;  %2224 = vperm.xlu0 %2570, %v2154_v56  }
  0x43   :  { %2399 = vmatmul.msk.f32.gmra.mxu0 %vm49_vm0, %v36_v57  ;;  %2419 = vmatmul.msk.f32.gmra.mxu1 %vm49_vm0, %v194_v58  ;;  %v381_v57 = vld [vmem:[%s4421_s1 + $0x1c8] sm:$0xff] }
  0x44   :  { %v558_v58 = vld [vmem:[%s4421_s1 + $0x268] sm:$0xff] }
  0x45   :  { %2229 = vperm.xlu2 %2572, %v2155_v9   ;;  %v383_v9 = vld [vmem:[%s4421_s1 + $0x1d8] sm:$0xff] }
  0x48   :  { %2440 = vmatmul.msk.f32.gmra.mxu2 %vm49_vm0, %v372_v60  ;;  %2460 = vmatmul.msk.f32.gmra.mxu3 %vm49_vm0, %v549_v61  ;;  %v46_v61 = vld [vmem:[%s4421_s1 + $0x88] sm:$0xff] }
  0x4a   :  { %2204 = vperm.xlu1 %2571, %v2150_v62   ;;  %2209 = vperm.xlu0 %2570, %v2151_v63   ;;  %v204_v62 = vld [vmem:[%s4421_s1 + $0x128] sm:$0xff] }
  0x4b   :  { %2400 = vmatmul.msk.f32.gmra.mxu0 %vm49_vm0, %v37_v0  ;;  %2420 = vmatmul.msk.f32.gmra.mxu1 %vm49_vm0, %v195_v1  ;;  %v382_v1 = vld [vmem:[%s4421_s1 + $0x1d0] sm:$0xff] }
  0x4d   :  { %2214 = vperm.xlu2 %2572, %v2152_v16  }
  0x50   :  { %2441 = vmatmul.msk.f32.gmra.mxu2 %vm49_vm0, %v373_v3  ;;  %2461 = vmatmul.msk.f32.gmra.mxu3 %vm49_vm0, %v550_v4 }
  0x52   :  { %2194 = vperm.xlu1 %2571, %v2148_v5   ;;  %2284 = vperm.xlu0 %2570, %v2166_v6   ;;  %v47_v5 = vld [vmem:[%s4421_s1 + $0x90] sm:$0xff] }
  0x53   :  { %2401 = vmatmul.msk.f32.gmra.mxu0 %vm49_vm0, %v38_v7  ;;  %2421 = vmatmul.msk.f32.gmra.mxu1 %vm49_vm0, %v196_v8  ;;  %v205_v6 = vld [vmem:[%s4421_s1 + $0x130] sm:$0xff] }
  0x55   :  { %2199 = vperm.xlu2 %2572, %v2149_v23  }
  0x58   :  { %2442 = vmatmul.msk.f32.gmra.mxu2 %vm49_vm0, %v374_v10  ;;  %2462 = vmatmul.msk.f32.gmra.mxu3 %vm49_vm0, %v551_v11  ;;  %v560_v10 = vld [vmem:[%s4421_s1 + $0x278] sm:$0xff] }
  0x5a   :  { %2274 = vperm.xlu1 %2571, %v2164_v12   ;;  %2189 = vperm.xlu0 %2570, %v2147_v13   ;;  %v48_v13 = vld [vmem:[%s4421_s1 + $0x98] sm:$0xff] }
  0x5b   :  { %2402 = vmatmul.msk.f32.gmra.mxu0 %vm49_vm0, %v39_v14  ;;  %2422 = vmatmul.msk.f32.gmra.mxu1 %vm49_vm0, %v197_v15  ;;  %v206_v14 = vld [vmem:[%s4421_s1 + $0x138] sm:$0xff] }
  0x5d   :  { %2279 = vperm.xlu2 %2572, %v2165_v30  }
  0x60   :  { %2443 = vmatmul.msk.f32.gmra.mxu2 %vm49_vm0, %v375_v17  ;;  %2463 = vmatmul.msk.f32.gmra.mxu3 %vm49_vm0, %v552_v18 }
  0x62   :  { %2179 = vperm.xlu1 %2571, %v2145_v19   ;;  %2269 = vperm.xlu0 %2570, %v2163_v20  }
  0x63   :  { %2403 = vmatmul.msk.f32.gmra.mxu0 %vm49_vm0, %v40_v21  ;;  %2423 = vmatmul.msk.f32.gmra.mxu1 %vm49_vm0, %v198_v22 }
  0x65   :  { %2184 = vperm.xlu2 %2572, %v2146_v37  }
  0x68   :  { %2444 = vmatmul.msk.f32.gmra.mxu2 %vm49_vm0, %v376_v24  ;;  %2464 = vmatmul.msk.f32.gmra.mxu3 %vm49_vm0, %v553_v25 }
  0x6a   :  { %2259 = vperm.xlu1 %2571, %v2161_v26   ;;  %2174 = vperm.xlu0 %2570, %v2144_v27  }
  0x6b   :  { %2404 = vmatmul.msk.f32.gmra.mxu0 %vm49_vm0, %v41_v28  ;;  %2424 = vmatmul.msk.f32.gmra.mxu1 %vm49_vm0, %v199_v29 }
  0x6d   :  { %2264 = vperm.xlu2 %2572, %v2162_v42  }
  0x70   :  { %2445 = vmatmul.msk.f32.gmra.mxu2 %vm49_vm0, %v377_v31  ;;  %2465 = vmatmul.msk.f32.gmra.mxu3 %vm49_vm0, %v554_v32 }
  0x72   :  { %2249 = vperm.xlu1 %2571, %v2159_v33   ;;  %2254 = vperm.xlu0 %2570, %v2160_v34  }
  0x73   :  { %2405 = vmatmul.msk.f32.gmra.mxu0 %vm49_vm0, %v42_v35  ;;  %2425 = vmatmul.msk.f32.gmra.mxu1 %vm49_vm0, %v200_v36 }
  0x75   :  { %2169 = vperm.xlu2 %2572, %v2143_v47  }
  0x78   :  { %2446 = vmatmul.msk.f32.gmra.mxu2 %vm49_vm0, %v378_v38  ;;  %2466 = vmatmul.msk.f32.gmra.mxu3 %vm49_vm0, %v555_v39 }
  0x7b   :  { %2406 = vmatmul.msk.f32.gmra.mxu0 %vm49_vm0, %v43_v40  ;;  %2426 = vmatmul.msk.f32.gmra.mxu1 %vm49_vm0, %v201_v41 }
  0x7d   :  { %2340 = vperm.xlu2 %2572, %v2337_v54   ;;  %v806_v54 = vpop.permute.xlu1 %805 }
  0x80   :  { %2447 = vmatmul.msk.f32.gmra.mxu2 %vm49_vm0, %v379_v43  ;;  %2467 = vmatmul.msk.f32.gmra.mxu3 %vm49_vm0, %v556_v44 }
  0x83   :  { %2407 = vmatmul.msk.f32.gmra.mxu0 %vm49_vm0, %v44_v45  ;;  %2427 = vmatmul.msk.f32.gmra.mxu1 %vm49_vm0, %v202_v46  ;;  %v816_v45 = vpop.permute.xlu0 %815 }
  0x88   :  { %2448 = vmatmul.msk.f32.gmra.mxu2 %vm49_vm0, %v380_v48  ;;  %v3018_v50 = vpop.f32.mrf.mxu0  ;;  %v3020_v51 = vpop.f32.mrf.mxu1  ;;  %2468 = vmatmul.msk.f32.gmra.mxu3 %vm49_vm0, %v557_v49 }
  0x89   :  { %4445 = vst [vmem:[#allocation2_spill] sm:$0xff] %v3018_v50 }
  0x8a   :  { %4446 = vst [vmem:[#allocation3_spill] sm:$0xff] %v3020_v51 }
  0x8b   :  { %v3032_v55 = vpop.f32.mrf.mxu2  ;;  %2408 = vmatmul.msk.f32.gmra.mxu0 %vm49_vm0, %v45_v52  ;;  %2428 = vmatmul.msk.f32.gmra.mxu1 %vm49_vm0, %v203_v53  ;;  %v3036_v56 = vpop.f32.mrf.mxu3 }
  0x8c   :  { %4447 = vst [vmem:[#allocation4_spill] sm:$0xff] %v3032_v55 }
  0x8d   :  { %4448 = vst [vmem:[#allocation5_spill] sm:$0xff] %v3036_v56 }
  0x90   :  { %2449 = vmatmul.msk.f32.gmra.mxu2 %vm49_vm0, %v381_v57  ;;  %v3045_v59 = vpop.f32.mrf.mxu0  ;;  %v3047_v60 = vpop.f32.mrf.mxu1  ;;  %2469 = vmatmul.msk.f32.gmra.mxu3 %vm49_vm0, %v558_v58 }
  0x91   :  { %4449 = vst [vmem:[#allocation6_spill] sm:$0xff] %v3045_v59  ;;  %v811_v57 = vpop.permute.xlu0 %810 }
  0x92   :  { %4450 = vst [vmem:[#allocation7_spill] sm:$0xff] %v3047_v60 }
  0x93   :  { %v3056_v63 = vpop.f32.mrf.mxu2  ;;  %2409 = vmatmul.msk.f32.gmra.mxu0 %vm49_vm0, %v46_v61  ;;  %2429 = vmatmul.msk.f32.gmra.mxu1 %vm49_vm0, %v204_v62  ;;  %v3060_v0 = vpop.f32.mrf.mxu3 }
  0x94   :  { %4451 = vst [vmem:[#allocation8_spill] sm:$0xff] %v3056_v63 }
  0x95   :  { %4452 = vst [vmem:[#allocation9_spill] sm:$0xff] %v3060_v0 }
  0x98   :  { %2450 = vmatmul.msk.f32.gmra.mxu2 %vm49_vm0, %v382_v1  ;;  %v3069_v3 = vpop.f32.mrf.mxu0  ;;  %v3071_v4 = vpop.f32.mrf.mxu1  ;;  %2470 = vmatmul.msk.f32.gmra.mxu3 %vm49_vm0, %v559_v2 }
  0x99   :  { %4453 = vst [vmem:[#allocation10_spill] sm:$0xff] %v3069_v3  ;;  %v796_v2 = vpop.permute.xlu2 %795 }
  0x9a   :  { %4454 = vst [vmem:[#allocation11_spill] sm:$0xff] %v3071_v4 }
  0x9b   :  { %v3080_v7 = vpop.f32.mrf.mxu2  ;;  %2410 = vmatmul.msk.f32.gmra.mxu0 %vm49_vm0, %v47_v5  ;;  %2430 = vmatmul.msk.f32.gmra.mxu1 %vm49_vm0, %v205_v6  ;;  %v3084_v8 = vpop.f32.mrf.mxu3 }
  0x9c   :  { %4455 = vst [vmem:[#allocation12_spill] sm:$0xff] %v3080_v7 }
  0x9d   :  { %4456 = vst [vmem:[#allocation13_spill] sm:$0xff] %v3084_v8 }
  0xa0   :  { %2451 = vmatmul.msk.f32.gmra.mxu2 %vm49_vm0, %v383_v9  ;;  %v3093_v11 = vpop.f32.mrf.mxu0  ;;  %v3095_v12 = vpop.f32.mrf.mxu1  ;;  %2471 = vmatmul.msk.f32.gmra.mxu3 %vm49_vm0, %v560_v10 }
  0xa1   :  { %v801_v9 = vpop.permute.xlu1 %800  ;;  %v3160_v10 = vpop.permute.xlu0 %785 }
  0xa2   :  { %4464 = vst [vmem:[#allocation21_spill] sm:$0xff] %v3160_v10  ;;  %v791_v8 = vpop.permute.xlu2 %790 }
  0xa3   :  { %v3104_v15 = vpop.f32.mrf.mxu2  ;;  %2411 = vmatmul.msk.f32.gmra.mxu0 %vm49_vm0, %v48_v13  ;;  %2431 = vmatmul.msk.f32.gmra.mxu1 %vm49_vm0, %v206_v14  ;;  %v3108_v16 = vpop.f32.mrf.mxu3 }
  0xa4   :  { %4457 = vst [vmem:[#allocation14_spill] sm:$0xff] %v3104_v15 }
  0xa5   :  { %4458 = vst [vmem:[#allocation15_spill] sm:$0xff] %v3108_v16 }
  0xa8   :  { %v3110_v17 = vpop.f32.mrf.mxu0  ;;  %v3112_v18 = vpop.f32.mrf.mxu1 }
  0xa9   :  { %v3162_v16 = vpop.permute.xlu1 %780  ;;  %v3164_v50 = vpop.permute.xlu0 %770 }
  0xaa   :  { %4465 = vst [vmem:[#allocation22_spill] sm:$0xff] %v3164_v50  ;;  %v776_v50 = vpop.permute.xlu2 %775 }
  0xab   :  { %v3114_v19 = vpop.f32.mrf.mxu2  ;;  %v3116_v20 = vpop.f32.mrf.mxu3 }
  0xac   :  { %4459 = vst [vmem:[#allocation16_spill] sm:$0xff] %v3114_v19 }
  0xad   :  { %4460 = vst [vmem:[#allocation17_spill] sm:$0xff] %v3116_v20 }
  0xb0   :  { %v3118_v21 = vpop.f32.mrf.mxu0  ;;  %v3120_v22 = vpop.f32.mrf.mxu1 }
  0xb3   :  { %v3122_v23 = vpop.f32.mrf.mxu2  ;;  %v3124_v24 = vpop.f32.mrf.mxu3 }
  0xb4   :  { %4461 = vst [vmem:[#allocation18_spill] sm:$0xff] %v3124_v24 }
  0xb8   :  { %v3126_v25 = vpop.f32.mrf.mxu0  ;;  %v3128_v26 = vpop.f32.mrf.mxu1 }
  0xbb   :  { %v3130_v27 = vpop.f32.mrf.mxu2  ;;  %v3132_v28 = vpop.f32.mrf.mxu3 }
  0xbc   :  { %4462 = vst [vmem:[#allocation19_spill] sm:$0xff] %v3132_v28 }
  0xc0   :  { %v3134_v29 = vpop.f32.mrf.mxu0  ;;  %v3136_v30 = vpop.f32.mrf.mxu1 }
  0xc3   :  { %v3138_v31 = vpop.f32.mrf.mxu2  ;;  %v3140_v32 = vpop.f32.mrf.mxu3 }
  0xc4   :  { %4463 = vst [vmem:[#allocation20_spill] sm:$0xff] %v3140_v32 }
  0xc8   :  { %v3142_v33 = vpop.f32.mrf.mxu0  ;;  %v3144_v34 = vpop.f32.mrf.mxu1 }
  0xcb   :  { %v3146_v35 = vpop.f32.mrf.mxu2  ;;  %v3148_v36 = vpop.f32.mrf.mxu3 }
  0xd0   :  { %v3150_v37 = vpop.f32.mrf.mxu0  ;;  %v3152_v38 = vpop.f32.mrf.mxu1 }
  0xd3   :  { %v488_v39 = vpop.f32.mrf.mxu2  ;;  %v3154_v40 = vpop.f32.mrf.mxu3 }
  0xd8   :  { %v157_v41 = vpop.f32.mrf.mxu0  ;;  %v314_v42 = vpop.f32.mrf.mxu1 }
  0xd9   :  { %v354_v3 = vmax.f32 %v157_v41, %v314_v42 }
  0xdb   :  { %v491_v43 = vpop.f32.mrf.mxu2  ;;  %v3156_v44 = vpop.f32.mrf.mxu3 }
  0xe0   :  { %v160_v46 = vpop.f32.mrf.mxu0  ;;  %v317_v47 = vpop.f32.mrf.mxu1 }
  0xe1   :  { %v355_v24 = vmax.f32 %v160_v46, %v317_v47  ;;  %v4468_v47 = vld [vmem:[#allocation11_spill] sm:$0xff] }
  0xe3   :  { %v494_v48 = vpop.f32.mrf.mxu2  ;;  %v3158_v49 = vpop.f32.mrf.mxu3 }
  0xe8   :  { %v163_v52 = vpop.f32.mrf.mxu0  ;;  %v320_v53 = vpop.f32.mrf.mxu1 }
  0xe9   :  { %v356_v51 = vmax.f32 %v163_v52, %v320_v53 }
  0xeb   :  { %v497_v58 = vpop.f32.mrf.mxu2  ;;  %v674_v61 = vpop.f32.mrf.mxu3 }
  0xec   :  { %v533_v4 = vmax.f32 %v356_v51, %v497_v58  ;;  %v351_v51 = vmax.f32 %v3134_v29, %v3136_v30 }
  0xf0   :  { %v166_v62 = vpop.f32.mrf.mxu0  ;;  %v323_v1 = vpop.f32.mrf.mxu1 }
  0xf1   :  { %v357_v63 = vmax.f32 %v166_v62, %v323_v1  ;;  %v353_v62 = vmax.f32 %v3150_v37, %v3152_v38  ;;  %v532_v1 = vmax.f32 %v355_v24, %v494_v48  ;;  %v4469_v48 = vld [vmem:[#allocation10_spill] sm:$0xff] }
  0xf3   :  { %v500_v5 = vpop.f32.mrf.mxu2  ;;  %v677_v6 = vpop.f32.mrf.mxu3 }
  0xf4   :  { %v534_v15 = vmax.f32 %v357_v63, %v500_v5  ;;  %v4472_v5 = vld [vmem:[#allocation14_spill] sm:$0xff] }
  0xf8   :  { %v169_v13 = vpop.f32.mrf.mxu0  ;;  %v326_v14 = vpop.f32.mrf.mxu1 }
  0xf9   :  { %v358_v55 = vmax.f32 %v169_v13, %v326_v14  ;;  %v711_v13 = vmax.f32 %v534_v15, %v677_v6  ;;  %v530_v15 = vmax.f32 %v353_v62, %v488_v39 }
  0xfb   :  { %v503_v56 = vpop.f32.mrf.mxu2  ;;  %v680_v0 = vpop.f32.mrf.mxu3 }
  0xfc   :  { %v535_v20 = vmax.f32 %v358_v55, %v503_v56  ;;  %v352_v55 = vmax.f32 %v3142_v33, %v3144_v34  ;;  %v531_v56 = vmax.f32 %v354_v3, %v491_v43  ;;  %v350_v3 = vmax.f32 %v3126_v25, %v3128_v26 }
  0xfd   :  { %v349_v34 = vmax.f32 %v3118_v21, %v3120_v22  ;;  %v528_v25 = vmax.f32 %v351_v51, %v3138_v31  ;;  %v707_v26 = vmax.f32 %v530_v15, %v3154_v40  ;;  %v347_v40 = vmax.f32 %v3093_v11, %v3095_v12  ;;  %v4470_v11 = vld [vmem:[#allocation16_spill] sm:$0xff] }
  0xfe   :  { %v712_v10 = vmax.f32 %v535_v20, %v680_v0  ;;  %v3178_v0 = vpop.permute.xlu0 %755  ;;  %v851_v20 = vadd.f32 %v806_v54, %v711_v13  ;;  %v708_v29 = vmax.f32 %v531_v56, %v3156_v44  ;;  %v527_v39 = vmax.f32 %v350_v3, %v3130_v27  ;;  %v761_v44 = vpop.permute.xlu2 %760  ;;  %v4471_v54 = vld [vmem:[#allocation19_spill] sm:$0xff]  ;;  %v4475_v13 = vld [vmem:[#allocation6_spill] sm:$0xff] }
  0xff   :  { %v524_v6 = vmax.f32 %v347_v40, %v4472_v5  ;;  %v4480_v3 = vld [vmem:[#allocation2_spill] sm:$0xff]  ;;  %v4486_v5 = vld [vmem:[#allocation5_spill] sm:$0xff] }
 0x100   :  { %v172_v7 = vpop.f32.mrf.mxu0  ;;  %v329_v59 = vpop.f32.mrf.mxu1  ;;  %v3199_v38 = vmax.f32 %v851_v20, 0.0  ;;  %v848_v43 = vadd.f32 %v791_v8, %v708_v29  ;;  %v4479_v20 = vld [vmem:[#allocation3_spill] sm:$0xff] }
 0x101   :  { %v359_v60 = vmax.f32 %v172_v7, %v329_v59  ;;  %v710_v59 = vmax.f32 %v533_v4, %v674_v61  ;;  %v852_v7 = vadd.f32 %v811_v57, %v712_v10  ;;  %v4481_v29 = vld [vmem:[#allocation15_spill] sm:$0xff] }
 0x102   :  { %v3231_v58 = vmax.f32 %v848_v43, 0.0 }
 0x103   :  { %v506_v28 = vpop.f32.mrf.mxu2  ;;  %v683_v19 = vpop.f32.mrf.mxu3  ;;  %v850_v30 = vadd.f32 %v801_v9, %v710_v59  ;;  %v3191_v33 = vmax.f32 %v852_v7, 0.0  ;;  %v4473_v9 = vld [vmem:[#allocation18_spill] sm:$0xff]  ;;  %v4477_v59 = vld [vmem:[#allocation17_spill] sm:$0xff] }
 0x104   :  { %v536_v32 = vmax.f32 %v359_v60, %v506_v28  ;;  %v3176_v60 = vpop.permute.xlu1 %765 }
 0x105   :  { %v3207_v21 = vmax.f32 %v850_v30, 0.0  ;;  %v701_v30 = vmax.f32 %v524_v6, %v4481_v29 }
 0x106   :  { %v713_v14 = vmax.f32 %v536_v32, %v683_v19  ;;  %v709_v19 = vmax.f32 %v532_v1, %v3158_v49  ;;  %v529_v32 = vmax.f32 %v352_v55, %v3146_v35  ;;  %v348_v35 = vmax.f32 %v3110_v17, %v3112_v18  ;;  %v4466_v18 = vld [vmem:[#allocation20_spill] sm:$0xff] }
 0x107   :  { %v526_v17 = vmax.f32 %v349_v34, %v3122_v23  ;;  %v705_v27 = vmax.f32 %v528_v25, %v4466_v18  ;;  %v346_v49 = vmax.f32 %v4469_v48, %v4468_v47  ;;  %v704_v23 = vmax.f32 %v527_v39, %v4471_v54  ;;  %v4476_v55 = vld [vmem:[#allocation12_spill] sm:$0xff] }
 0x108   :  { %v853_v63 = vadd.f32 %v816_v45, %v713_v14  ;;  %v3170_v46 = vpop.f32.mrf.mxu0  ;;  %v3172_v41 = vpop.f32.mrf.mxu1  ;;  %v849_v37 = vadd.f32 %v796_v2, %v709_v19  ;;  %v706_v42 = vmax.f32 %v529_v32, %v3148_v36  ;;  %v4467_v36 = vld [vmem:[#allocation21_spill] sm:$0xff]  ;;  %v525_v12 = vmax.f32 %v348_v35, %v4470_v11 }
 0x109   :  { %v847_v8 = vadd.f32 %v4467_v36, %v707_v26  ;;  %v3237_v2 = vpop.permute.xlu0 %830  ;;  %v703_v10 = vmax.f32 %v526_v17, %v4473_v9  ;;  %v845_v62 = vadd.f32 %v776_v50, %v705_v27  ;;  %v523_v56 = vmax.f32 %v346_v49, %v4476_v55  ;;  %v4482_v26 = vld [vmem:[#allocation8_spill] sm:$0xff]  ;;  %v751_v36 = vpop.permute.xlu2 %750 }
 0x10a   :  { %v3181_v24 = vmax.f32 %v853_v63, 0.0  ;;  %v3220_v45 = vmax.f32 %v849_v37, 0.0  ;;  %v846_v57 = vadd.f32 %v3162_v16, %v706_v42  ;;  %v4474_v16 = vld [vmem:[#allocation7_spill] sm:$0xff]  ;;  %v702_v7 = vmax.f32 %v525_v12, %v4477_v59  ;;  %v4478_v63 = vld [vmem:[#allocation22_spill] sm:$0xff]  ;;  %v4483_v42 = vld [vmem:[#allocation13_spill] sm:$0xff] }
 0x10b   :  { %v3185_v4 = vpop.f32.mrf.mxu2  ;;  %v3187_v28 = vpop.f32.mrf.mxu3  ;;  %v3241_v1 = vmax.f32 %v847_v8, 0.0  ;;  %v345_v14 = vmax.f32 %v4475_v13, %v4474_v16  ;;  %v844_v51 = vadd.f32 %v4478_v63, %v704_v23  ;;  %v344_v32 = vmax.f32 %v4480_v3, %v4479_v20 }
 0x10c   :  { %999 = vmatpush.msrb.mxu0 %v3181_v24  ;;  %1297 = vmatpush.msrb.mxu2 %v3181_v24  ;;  %v3235_v61 = vpop.permute.xlu1 %835  ;;  %v3250_v15 = vmax.f32 %v846_v57, 0.0  ;;  %v843_v34 = vadd.f32 %v3176_v60, %v703_v10  ;;  %v3258_v25 = vmax.f32 %v845_v62, 0.0  ;;  %v700_v43 = vmax.f32 %v523_v56, %v4483_v42  ;;  %v4484_v60 = vld [vmem:[#allocation4_spill] sm:$0xff]  ;;  %v1184_v42 = vld [vmem:[%s4424_s3 + $0x1b8] sm:$0xff] }
 0x10d   :  { %v522_v37 = vmax.f32 %v345_v14, %v4482_v26  ;;  %v842_v40 = vadd.f32 %v761_v44, %v702_v7  ;;  %v3264_v17 = vmax.f32 %v844_v51, 0.0  ;;  %v521_v27 = vmax.f32 %v344_v32, %v4484_v60  ;;  %v4485_v44 = vld [vmem:[#allocation9_spill] sm:$0xff]  ;;  %v1182_v26 = vld [vmem:[%s4424_s3 + $0x1a8] sm:$0xff]  ;;  %v888_v60 = vld [vmem:[%s4424_s3 + $0x50] sm:$0xff] }
 0x10e   :  { %1000 = vmatpush.msrb.mxu0 %v3191_v33  ;;  %1298 = vmatpush.msrb.mxu2 %v3191_v33  ;;  %v841_v8 = vadd.f32 %v3178_v0, %v701_v30  ;;  %v3270_v47 = vmax.f32 %v843_v34, 0.0  ;;  %v840_v54 = vadd.f32 %v751_v36, %v700_v43  ;;  %v360_v57 = vmax.f32 %v3170_v46, %v3172_v41  ;;  %v879_v30 = vld [vmem:[%s4424_s3 + $0x8] sm:$0xff]  ;;  %v886_v43 = vld [vmem:[%s4424_s3 + $0x40] sm:$0xff]  ;;  %v1187_v36 = vld [vmem:[%s4424_s3 + $0x1d0] sm:$0xff] }
 0x10f   :  { %v699_v49 = vmax.f32 %v522_v37, %v4485_v44  ;;  %v3277_v23 = vmax.f32 %v842_v40, 0.0  ;;  %v698_v6 = vmax.f32 %v521_v27, %v4486_v5  ;;  %v883_v34 = vld [vmem:[%s4424_s3 + $0x28] sm:$0xff]  ;;  %v884_v37 = vld [vmem:[%s4424_s3 + $0x30] sm:$0xff]  ;;  %v889_v27 = vld [vmem:[%s4424_s3 + $0x58] sm:$0xff] }
 0x110   :  { %1001 = vmatpush.msrb.mxu0 %v3199_v38  ;;  %1299 = vmatpush.msrb.mxu2 %v3199_v38  ;;  %v3211_v22 = vpop.f32.mrf.mxu0  ;;  %v3213_v31 = vpop.f32.mrf.mxu1  ;;  %v3284_v62 = vmax.f32 %v841_v8, 0.0  ;;  %v3288_v14 = vmax.f32 %v840_v54, 0.0  ;;  %v537_v55 = vmax.f32 %v360_v57, %v3185_v4  ;;  %v887_v40 = vld [vmem:[%s4424_s3 + $0x48] sm:$0xff]  ;;  %v1188_v8 = vld [vmem:[%s4424_s3 + $0x1d8] sm:$0xff]  ;;  %v1189_v44 = vld [vmem:[%s4424_s3 + $0x1e0] sm:$0xff] }
 0x111   :  { %v361_v48 = vmax.f32 %v3211_v22, %v3213_v31  ;;  %v741_v12 = vpop.permute.xlu0 %740  ;;  %v826_v20 = vpop.permute.xlu2 %825  ;;  %v1191_v54 = vld [vmem:[%s4424_s3 + $0x1f0] sm:$0xff]  ;;  %v894_v57 = vld [vmem:[%s4424_s3 + $0x80] sm:$0xff] }
 0x112   :  { %1002 = vmatpush.msrb.mxu0 %v3207_v21  ;;  %1300 = vmatpush.msrb.mxu2 %v3207_v21  ;;  %v838_v13 = vadd.f32 %v741_v12, %v698_v6  ;;  %v893_v12 = vld [vmem:[%s4424_s3 + $0x78] sm:$0xff]  ;;  %v896_v5 = vld [vmem:[%s4424_s3 + $0x90] sm:$0xff] }
 0x113   :  { %v512_v52 = vpop.f32.mrf.mxu2  ;;  %v3226_v53 = vpop.f32.mrf.mxu3  ;;  %v897_v6 = vld [vmem:[%s4424_s3 + $0x98] sm:$0xff] }
 0x114   :  { %1003 = vmatpush.msrb.mxu0 %v3220_v45  ;;  %1301 = vmatpush.msrb.mxu2 %v3220_v45  ;;  %v746_v11 = vpop.permute.xlu1 %745  ;;  %v538_v16 = vmax.f32 %v361_v48, %v512_v52  ;;  %v3298_v51 = vmax.f32 %v838_v13, 0.0  ;;  %v891_v48 = vld [vmem:[%s4424_s3 + $0x68] sm:$0xff]  ;;  %v1197_v13 = vld [vmem:[%s4424_s3 + $0x220] sm:$0xff] }
 0x115   :  { %v839_v10 = vadd.f32 %v746_v11, %v699_v49  ;;  %v1190_v49 = vld [vmem:[%s4424_s3 + $0x1e8] sm:$0xff]  ;;  %v892_v11 = vld [vmem:[%s4424_s3 + $0x70] sm:$0xff] }
 0x116   :  { %1004 = vmatpush.msrb.mxu0 %v3231_v58  ;;  %1302 = vmatpush.msrb.mxu2 %v3231_v58  ;;  %v715_v52 = vmax.f32 %v538_v16, %v3226_v53  ;;  %v899_v16 = vld [vmem:[%s4424_s3 + $0xa8] sm:$0xff] }
 0x117   :  { %v3293_v7 = vmax.f32 %v839_v10, 0.0  ;;  %v1196_v10 = vld [vmem:[%s4424_s3 + $0x218] sm:$0xff] }
 0x118   :  { %1005 = vmatpush.msrb.mxu0 %v3241_v1  ;;  %1303 = vmatpush.msrb.mxu2 %v3241_v1  ;;  %v181_v50 = vpop.f32.mrf.mxu0  ;;  %v338_v19 = vpop.f32.mrf.mxu1  ;;  %v855_v3 = vadd.f32 %v826_v20, %v715_v52  ;;  %v1201_v52 = vld [vmem:[%s4424_s3 + $0x240] sm:$0xff] }
 0x119   :  { %v362_v18 = vmax.f32 %v181_v50, %v338_v19  ;;  %v714_v50 = vmax.f32 %v537_v55, %v3187_v28  ;;  %v1199_v55 = vld [vmem:[%s4424_s3 + $0x230] sm:$0xff]  ;;  %v906_v20 = vld [vmem:[%s4424_s3 + $0xe0] sm:$0xff] }
 0x11a   :  { %1006 = vmatpush.msrb.mxu0 %v3250_v15  ;;  %1304 = vmatpush.msrb.mxu2 %v3250_v15 }
 0x11b   :  { %v515_v35 = vpop.f32.mrf.mxu2  ;;  %v692_v39 = vpop.f32.mrf.mxu3 }
 0x11c   :  { %1007 = vmatpush.msrb.mxu0 %v3258_v25  ;;  %1305 = vmatpush.msrb.mxu2 %v3258_v25  ;;  %v539_v0 = vmax.f32 %v362_v18, %v515_v35  ;;  %v821_v32 = vpop.permute.xlu1 %820  ;;  %v885_v35 = vld [vmem:[%s4424_s3 + $0x38] sm:$0xff]  ;;  %v1186_v18 = vld [vmem:[%s4424_s3 + $0x1c8] sm:$0xff] }
 0x11d   :  { %v854_v28 = vadd.f32 %v821_v32, %v714_v50  ;;  %v905_v50 = vld [vmem:[%s4424_s3 + $0xd8] sm:$0xff]  ;;  %v1206_v32 = vld [vmem:[%s4424_s3 + $0x268] sm:$0xff] }
 0x11e   :  { %1008 = vmatpush.msrb.mxu0 %v3264_v17  ;;  %1306 = vmatpush.msrb.mxu2 %v3264_v17  ;;  %v716_v56 = vmax.f32 %v539_v0, %v692_v39  ;;  %v1183_v39 = vld [vmem:[%s4424_s3 + $0x1b0] sm:$0xff]  ;;  %v895_v0 = vld [vmem:[%s4424_s3 + $0x88] sm:$0xff] }
 0x11f   :  { %v874_v29 = vmax.f32 %v854_v28, 0.0  ;;  %v908_v28 = vld [vmem:[%s4424_s3 + $0xf0] sm:$0xff] }
 0x120   :  { %1009 = vmatpush.msrb.mxu0 %v3270_v47  ;;  %1307 = vmatpush.msrb.mxu2 %v3270_v47  ;;  %v184_v22 = vpop.f32.mrf.mxu0  ;;  %v341_v31 = vpop.f32.mrf.mxu1  ;;  %v856_v4 = vadd.f32 %v3237_v2, %v716_v56  ;;  %v1200_v56 = vld [vmem:[%s4424_s3 + $0x238] sm:$0xff] }
 0x121   :  { %v363_v9 = vmax.f32 %v184_v22, %v341_v31  ;;  %v1193_v22 = vld [vmem:[%s4424_s3 + $0x200] sm:$0xff]  ;;  %v1194_v31 = vld [vmem:[%s4424_s3 + $0x208] sm:$0xff] }
 0x122   :  { %1010 = vmatpush.msrb.mxu0 %v3277_v23  ;;  %1308 = vmatpush.msrb.mxu2 %v3277_v23  ;;  %v876_v2 = vmax.f32 %v856_v4, 0.0  ;;  %v1203_v4 = vld [vmem:[%s4424_s3 + $0x250] sm:$0xff] }
 0x123   :  { %v518_v46 = vpop.f32.mrf.mxu2  ;;  %v695_v41 = vpop.f32.mrf.mxu3 }
 0x124   :  { %v540_v59 = vmax.f32 %v363_v9, %v518_v46  ;;  %1011 = vmatpush.msrb.mxu0 %v3284_v62  ;;  %1309 = vmatpush.msrb.mxu2 %v3284_v62  ;;  %v1195_v9 = vld [vmem:[%s4424_s3 + $0x210] sm:$0xff]  ;;  %v1198_v46 = vld [vmem:[%s4424_s3 + $0x228] sm:$0xff] }
 0x126   :  { %v717_v63 = vmax.f32 %v540_v59, %v695_v41  ;;  %1012 = vmatpush.msrb.mxu0 %v3288_v14  ;;  %1310 = vmatpush.msrb.mxu2 %v3288_v14  ;;  %v900_v41 = vld [vmem:[%s4424_s3 + $0xb0] sm:$0xff]  ;;  %v902_v59 = vld [vmem:[%s4424_s3 + $0xc0] sm:$0xff] }
 0x128   :  { %v857_v19 = vadd.f32 %v3235_v61, %v717_v63  ;;  %1013 = vmatpush.msrb.mxu0 %v3293_v7  ;;  %1311 = vmatpush.msrb.mxu2 %v3293_v7  ;;  %v875_v61 = vmax.f32 %v855_v3, 0.0  ;;  %v1202_v63 = vld [vmem:[%s4424_s3 + $0x248] sm:$0xff] }
 0x129   :  { %v907_v3 = vld [vmem:[%s4424_s3 + $0xe8] sm:$0xff] }
 0x12a   :  { %v877_v53 = vmax.f32 %v857_v19, 0.0  ;;  %1014 = vmatpush.msrb.mxu0 %v3298_v51  ;;  %1312 = vmatpush.msrb.mxu2 %v3298_v51  ;;  %v1204_v19 = vld [vmem:[%s4424_s3 + $0x258] sm:$0xff] }
 0x12c   :  { %1619 = vmatpush.msra.mxu0 %v3181_v24  ;;  %1941 = vmatpush.msra.mxu2 %v3181_v24  ;;  %v878_v24 = vld [vmem:[%s4424_s3] sm:$0xff] }
 0x12d   :  { %1100 = vmatpush.msrb.mxu1 %v877_v53  ;;  %1398 = vmatpush.msrb.mxu3 %v877_v53 }
 0x12e   :  { %1620 = vmatpush.msra.mxu0 %v3191_v33  ;;  %1942 = vmatpush.msra.mxu2 %v3191_v33  ;;  %v1177_v33 = vld [vmem:[%s4424_s3 + $0x180] sm:$0xff] }
 0x12f   :  { %1101 = vmatpush.msrb.mxu1 %v876_v2  ;;  %1399 = vmatpush.msrb.mxu3 %v876_v2 }
 0x130   :  { %1621 = vmatpush.msra.mxu0 %v3199_v38  ;;  %1943 = vmatpush.msra.mxu2 %v3199_v38  ;;  %v1178_v38 = vld [vmem:[%s4424_s3 + $0x188] sm:$0xff] }
 0x131   :  { %1102 = vmatpush.msrb.mxu1 %v875_v61  ;;  %1400 = vmatpush.msrb.mxu3 %v875_v61 }
 0x132   :  { %1622 = vmatpush.msra.mxu0 %v3207_v21  ;;  %1944 = vmatpush.msra.mxu2 %v3207_v21  ;;  %v880_v21 = vld [vmem:[%s4424_s3 + $0x10] sm:$0xff] }
 0x133   :  { %1103 = vmatpush.msrb.mxu1 %v874_v29  ;;  %1401 = vmatpush.msrb.mxu3 %v874_v29 }
 0x134   :  { %1015 = vmatmul.f32.vlgmr.msrb.gmra.mxu0 %v878_v24  ;;  %2472 = vmatmul.msk.f32.vlgmr.msrb.gmra.mxu1 %vm926_vm1, %v879_v30 }
 0x135   :  { %1313 = vmatmul.f32.vlgmr.msrb.gmra.mxu2 %v1177_v33  ;;  %2496 = vmatmul.msk.f32.vlgmr.msrb.gmra.mxu3 %vm926_vm1, %v1178_v38  ;;  %v910_v33 = vld [vmem:[%s4424_s3 + $0x100] sm:$0xff]  ;;  %v911_v38 = vld [vmem:[%s4424_s3 + $0x108] sm:$0xff] }
 0x136   :  { %1623 = vmatpush.msra.mxu0 %v3220_v45  ;;  %1720 = vmatpush.msra.mxu1 %v877_v53 }
 0x137   :  { %1945 = vmatpush.msra.mxu2 %v3220_v45  ;;  %2042 = vmatpush.msra.mxu3 %v877_v53  ;;  %v881_v45 = vld [vmem:[%s4424_s3 + $0x18] sm:$0xff]  ;;  %v1205_v53 = vld [vmem:[%s4424_s3 + $0x260] sm:$0xff] }
 0x138   :  { %1624 = vmatpush.msra.mxu0 %v3231_v58  ;;  %1721 = vmatpush.msra.mxu1 %v876_v2 }
 0x139   :  { %1946 = vmatpush.msra.mxu2 %v3231_v58  ;;  %2043 = vmatpush.msra.mxu3 %v876_v2  ;;  %v1179_v58 = vld [vmem:[%s4424_s3 + $0x190] sm:$0xff]  ;;  %v909_v2 = vld [vmem:[%s4424_s3 + $0xf8] sm:$0xff] }
 0x13a   :  { %1625 = vmatpush.msra.mxu0 %v3241_v1  ;;  %1722 = vmatpush.msra.mxu1 %v875_v61 }
 0x13b   :  { %1947 = vmatpush.msra.mxu2 %v3241_v1  ;;  %2044 = vmatpush.msra.mxu3 %v875_v61  ;;  %v1180_v1 = vld [vmem:[%s4424_s3 + $0x198] sm:$0xff]  ;;  %v1207_v61 = vld [vmem:[%s4424_s3 + $0x270] sm:$0xff] }
 0x13c   :  { %1626 = vmatpush.msra.mxu0 %v3250_v15  ;;  %1723 = vmatpush.msra.mxu1 %v874_v29 }
 0x13d   :  { %1948 = vmatpush.msra.mxu2 %v3250_v15  ;;  %2045 = vmatpush.msra.mxu3 %v874_v29  ;;  %v882_v15 = vld [vmem:[%s4424_s3 + $0x20] sm:$0xff]  ;;  %v1208_v29 = vld [vmem:[%s4424_s3 + $0x278] sm:$0xff] }
 0x13e   :  { %1018 = vmatmul.f32.gmra.mxu0 %v880_v21  ;;  %2473 = vmatmul.msk.f32.gmra.mxu1 %vm926_vm1, %v881_v45  ;;  %v1209_v21 = vld [vmem:[%s4424_s3 + $0x280] sm:$0xff]  ;;  %v1210_v45 = vld [vmem:[%s4424_s3 + $0x288] sm:$0xff] }
 0x13f   :  { %1316 = vmatmul.f32.gmra.mxu2 %v1179_v58  ;;  %2497 = vmatmul.msk.f32.gmra.mxu3 %vm926_vm1, %v1180_v1 }
 0x140   :  { %1627 = vmatpush.msra.mxu0 %v3258_v25  ;;  %1949 = vmatpush.msra.mxu2 %v3258_v25  ;;  %v1181_v25 = vld [vmem:[%s4424_s3 + $0x1a0] sm:$0xff] }
 0x142   :  { %1628 = vmatpush.msra.mxu0 %v3264_v17  ;;  %1950 = vmatpush.msra.mxu2 %v3264_v17  ;;  %v1185_v17 = vld [vmem:[%s4424_s3 + $0x1c0] sm:$0xff] }
 0x144   :  { %1629 = vmatpush.msra.mxu0 %v3270_v47  ;;  %1951 = vmatpush.msra.mxu2 %v3270_v47  ;;  %v890_v47 = vld [vmem:[%s4424_s3 + $0x60] sm:$0xff] }
 0x146   :  { %1630 = vmatpush.msra.mxu0 %v3277_v23  ;;  %1952 = vmatpush.msra.mxu2 %v3277_v23  ;;  %v1192_v23 = vld [vmem:[%s4424_s3 + $0x1f8] sm:$0xff] }
 0x147   :  { %1021 = vmatmul.f32.gmra.mxu0 %v882_v15  ;;  %2474 = vmatmul.msk.f32.gmra.mxu1 %vm926_vm1, %v883_v34 }
 0x148   :  { %1319 = vmatmul.f32.gmra.mxu2 %v1181_v25  ;;  %2498 = vmatmul.msk.f32.gmra.mxu3 %vm926_vm1, %v1182_v26  ;;  %v912_v26 = vld [vmem:[%s4424_s3 + $0x110] sm:$0xff] }
 0x149   :  { %1631 = vmatpush.msra.mxu0 %v3284_v62  ;;  %1953 = vmatpush.msra.mxu2 %v3284_v62  ;;  %v898_v62 = vld [vmem:[%s4424_s3 + $0xa0] sm:$0xff] }
 0x14b   :  { %1632 = vmatpush.msra.mxu0 %v3288_v14  ;;  %1954 = vmatpush.msra.mxu2 %v3288_v14  ;;  %v901_v14 = vld [vmem:[%s4424_s3 + $0xb8] sm:$0xff] }
 0x14d   :  { %1633 = vmatpush.msra.mxu0 %v3293_v7  ;;  %1955 = vmatpush.msra.mxu2 %v3293_v7  ;;  %v903_v7 = vld [vmem:[%s4424_s3 + $0xc8] sm:$0xff] }
 0x14f   :  { %1634 = vmatpush.msra.mxu0 %v3298_v51  ;;  %1956 = vmatpush.msra.mxu2 %v3298_v51  ;;  %v904_v51 = vld [vmem:[%s4424_s3 + $0xd0] sm:$0xff] }
 0x150   :  { %1024 = vmatmul.f32.gmra.mxu0 %v884_v37  ;;  %2475 = vmatmul.msk.f32.gmra.mxu1 %vm926_vm1, %v885_v35  ;;  %v913_v37 = vld [vmem:[%s4424_s3 + $0x118] sm:$0xff]  ;;  %v1211_v35 = vld [vmem:[%s4424_s3 + $0x290] sm:$0xff] }
 0x151   :  { %1322 = vmatmul.f32.gmra.mxu2 %v1183_v39  ;;  %2499 = vmatmul.msk.f32.gmra.mxu3 %vm926_vm1, %v1184_v42  ;;  %v1212_v39 = vld [vmem:[%s4424_s3 + $0x298] sm:$0xff] }
 0x158   :  { %1027 = vmatmul.f32.gmra.mxu0 %v886_v43  ;;  %2476 = vmatmul.msk.f32.gmra.mxu1 %vm926_vm1, %v887_v40 }
 0x159   :  { %1325 = vmatmul.f32.gmra.mxu2 %v1185_v17  ;;  %2500 = vmatmul.msk.f32.gmra.mxu3 %vm926_vm1, %v1186_v18 }
 0x160   :  { %1030 = vmatmul.f32.gmra.mxu0 %v888_v60  ;;  %2477 = vmatmul.msk.f32.gmra.mxu1 %vm926_vm1, %v889_v27  ;;  %v914_v60 = vld [vmem:[%s4424_s3 + $0x120] sm:$0xff]  ;;  %v915_v27 = vld [vmem:[%s4424_s3 + $0x128] sm:$0xff] }
 0x161   :  { %1328 = vmatmul.f32.gmra.mxu2 %v1187_v36  ;;  %2501 = vmatmul.msk.f32.gmra.mxu3 %vm926_vm1, %v1188_v8  ;;  %v1213_v36 = vld [vmem:[%s4424_s3 + $0x2a0] sm:$0xff]  ;;  %v1214_v8 = vld [vmem:[%s4424_s3 + $0x2a8] sm:$0xff] }
 0x168   :  { %1033 = vmatmul.f32.gmra.mxu0 %v890_v47  ;;  %2478 = vmatmul.msk.f32.gmra.mxu1 %vm926_vm1, %v891_v48 }
 0x169   :  { %1331 = vmatmul.f32.gmra.mxu2 %v1189_v44  ;;  %2502 = vmatmul.msk.f32.gmra.mxu3 %vm926_vm1, %v1190_v49 }
 0x170   :  { %1036 = vmatmul.f32.gmra.mxu0 %v892_v11  ;;  %2479 = vmatmul.msk.f32.gmra.mxu1 %vm926_vm1, %v893_v12  ;;  %v916_v12 = vld [vmem:[%s4424_s3 + $0x130] sm:$0xff] }
 0x171   :  { %1334 = vmatmul.f32.gmra.mxu2 %v1191_v54  ;;  %2503 = vmatmul.msk.f32.gmra.mxu3 %vm926_vm1, %v1192_v23  ;;  %v917_v54 = vld [vmem:[%s4424_s3 + $0x138] sm:$0xff]  ;;  %v1215_v23 = vld [vmem:[%s4424_s3 + $0x2b0] sm:$0xff] }
 0x178   :  { %1039 = vmatmul.f32.gmra.mxu0 %v894_v57  ;;  %2480 = vmatmul.msk.f32.gmra.mxu1 %vm926_vm1, %v895_v0  ;;  %v1216_v57 = vld [vmem:[%s4424_s3 + $0x2b8] sm:$0xff] }
 0x179   :  { %1337 = vmatmul.f32.gmra.mxu2 %v1193_v22  ;;  %2504 = vmatmul.msk.f32.gmra.mxu3 %vm926_vm1, %v1194_v31 }
 0x180   :  { %1042 = vmatmul.f32.gmra.mxu0 %v896_v5  ;;  %2481 = vmatmul.msk.f32.gmra.mxu1 %vm926_vm1, %v897_v6 }
 0x181   :  { %1340 = vmatmul.f32.gmra.mxu2 %v1195_v9  ;;  %2505 = vmatmul.msk.f32.gmra.mxu3 %vm926_vm1, %v1196_v10  ;;  %v918_v9 = vld [vmem:[%s4424_s3 + $0x140] sm:$0xff]  ;;  %v919_v10 = vld [vmem:[%s4424_s3 + $0x148] sm:$0xff] }
 0x188   :  { %1045 = vmatmul.f32.gmra.mxu0 %v898_v62  ;;  %2482 = vmatmul.msk.f32.gmra.mxu1 %vm926_vm1, %v899_v16  ;;  %v1217_v62 = vld [vmem:[%s4424_s3 + $0x2c0] sm:$0xff]  ;;  %v1218_v16 = vld [vmem:[%s4424_s3 + $0x2c8] sm:$0xff] }
 0x189   :  { %1343 = vmatmul.f32.gmra.mxu2 %v1197_v13  ;;  %2506 = vmatmul.msk.f32.gmra.mxu3 %vm926_vm1, %v1198_v46 }
 0x190   :  { %1048 = vmatmul.f32.gmra.mxu0 %v900_v41  ;;  %2483 = vmatmul.msk.f32.gmra.mxu1 %vm926_vm1, %v901_v14 }
 0x191   :  { %1346 = vmatmul.f32.gmra.mxu2 %v1199_v55  ;;  %2507 = vmatmul.msk.f32.gmra.mxu3 %vm926_vm1, %v1200_v56  ;;  %v920_v56 = vld [vmem:[%s4424_s3 + $0x150] sm:$0xff] }
 0x198   :  { %1051 = vmatmul.f32.gmra.mxu0 %v902_v59  ;;  %2484 = vmatmul.msk.f32.gmra.mxu1 %vm926_vm1, %v903_v7  ;;  %v921_v59 = vld [vmem:[%s4424_s3 + $0x158] sm:$0xff]  ;;  %v1219_v7 = vld [vmem:[%s4424_s3 + $0x2d0] sm:$0xff] }
 0x199   :  { %1349 = vmatmul.f32.gmra.mxu2 %v1201_v52  ;;  %2508 = vmatmul.msk.f32.gmra.mxu3 %vm926_vm1, %v1202_v63  ;;  %v1220_v52 = vld [vmem:[%s4424_s3 + $0x2d8] sm:$0xff] }
 0x1a0   :  { %1054 = vmatmul.f32.gmra.mxu0 %v904_v51  ;;  %2485 = vmatmul.msk.f32.gmra.mxu1 %vm926_vm1, %v905_v50 }
 0x1a1   :  { %1352 = vmatmul.f32.gmra.mxu2 %v1203_v4  ;;  %2509 = vmatmul.msk.f32.gmra.mxu3 %vm926_vm1, %v1204_v19 }
 0x1a8   :  { %1057 = vmatmul.f32.gmra.mxu0 %v906_v20  ;;  %2486 = vmatmul.msk.f32.gmra.mxu1 %vm926_vm1, %v907_v3  ;;  %v922_v20 = vld [vmem:[%s4424_s3 + $0x160] sm:$0xff]  ;;  %v923_v3 = vld [vmem:[%s4424_s3 + $0x168] sm:$0xff] }
 0x1a9   :  { %1355 = vmatmul.f32.gmra.mxu2 %v1205_v53  ;;  %2510 = vmatmul.msk.f32.gmra.mxu3 %vm926_vm1, %v1206_v32  ;;  %v1221_v53 = vld [vmem:[%s4424_s3 + $0x2e0] sm:$0xff]  ;;  %v1222_v32 = vld [vmem:[%s4424_s3 + $0x2e8] sm:$0xff] }
 0x1b0   :  { %1060 = vmatmul.f32.gmra.mxu0 %v908_v28  ;;  %2487 = vmatmul.msk.f32.gmra.mxu1 %vm926_vm1, %v909_v2 }
 0x1b1   :  { %1358 = vmatmul.f32.gmra.mxu2 %v1207_v61  ;;  %2511 = vmatmul.msk.f32.gmra.mxu3 %vm926_vm1, %v1208_v29  ;;  %v3563_v24 = vpop.f32.mrf.mxu0  ;;  %v3565_v30 = vpop.f32.mrf.mxu1 }
 0x1b8   :  { %1063 = vmatmul.f32.gmra.mxu0 %v910_v33  ;;  %2488 = vmatmul.msk.f32.gmra.mxu1 %vm926_vm1, %v911_v38  ;;  %v1314_v58 = vpop.f32.mrf.mxu2  ;;  %v1403_v1 = vpop.f32.mrf.mxu3  ;;  %v924_v38 = vld [vmem:[%s4424_s3 + $0x170] sm:$0xff] }
 0x1b9   :  { %1361 = vmatmul.f32.gmra.mxu2 %v1209_v21  ;;  %2512 = vmatmul.msk.f32.gmra.mxu3 %vm926_vm1, %v1210_v45  ;;  %v3581_v15 = vadd.f32 %v1403_v1, %v1314_v58  ;;  %v925_v21 = vld [vmem:[%s4424_s3 + $0x178] sm:$0xff]  ;;  %v1223_v45 = vld [vmem:[%s4424_s3 + $0x2f0] sm:$0xff] }
 0x1ba   :  { %v1224_v58 = vld [vmem:[%s4424_s3 + $0x2f8] sm:$0xff] }
 0x1bb   :  { %v3583_v34 = vpop.f32.mrf.mxu0  ;;  %v3585_v25 = vpop.f32.mrf.mxu1 }
 0x1c0   :  { %1066 = vmatmul.f32.gmra.mxu0 %v912_v26  ;;  %2489 = vmatmul.msk.f32.gmra.mxu1 %vm926_vm1, %v913_v37 }
 0x1c1   :  { %1364 = vmatmul.f32.gmra.mxu2 %v1211_v35  ;;  %2513 = vmatmul.msk.f32.gmra.mxu3 %vm926_vm1, %v1212_v39 }
 0x1c2   :  { %v1317_v42 = vpop.f32.mrf.mxu2  ;;  %v1406_v43 = vpop.f32.mrf.mxu3 }
 0x1c3   :  { %v3601_v40 = vadd.f32 %v1406_v43, %v1317_v42  ;;  %v1499_v42 = vld [vmem:[%s4424_s3 + $0x300] sm:$0xff]  ;;  %v1500_v43 = vld [vmem:[%s4424_s3 + $0x308] sm:$0xff] }
 0x1c4   :  { %v3603_v17 = vpop.f32.mrf.mxu0  ;;  %v3605_v18 = vpop.f32.mrf.mxu1 }
 0x1c8   :  { %1069 = vmatmul.f32.gmra.mxu0 %v914_v60  ;;  %2490 = vmatmul.msk.f32.gmra.mxu1 %vm926_vm1, %v915_v27  ;;  %v1821_v60 = vld [vmem:[%s4424_s3 + $0x480] sm:$0xff]  ;;  %v1822_v27 = vld [vmem:[%s4424_s3 + $0x488] sm:$0xff] }
 0x1c9   :  { %1367 = vmatmul.f32.gmra.mxu2 %v1213_v36  ;;  %2514 = vmatmul.msk.f32.gmra.mxu3 %vm926_vm1, %v1214_v8 }
 0x1cb   :  { %v1320_v47 = vpop.f32.mrf.mxu2  ;;  %v1409_v48 = vpop.f32.mrf.mxu3 }
 0x1cc   :  { %v3621_v44 = vadd.f32 %v1409_v48, %v1320_v47 }
 0x1cd   :  { %v3623_v49 = vpop.f32.mrf.mxu0  ;;  %v3625_v11 = vpop.f32.mrf.mxu1 }
 0x1d0   :  { %1072 = vmatmul.f32.gmra.mxu0 %v916_v12  ;;  %2491 = vmatmul.msk.f32.gmra.mxu1 %vm926_vm1, %v917_v54  ;;  %v1501_v54 = vld [vmem:[%s4424_s3 + $0x310] sm:$0xff] }
 0x1d1   :  { %1370 = vmatmul.f32.gmra.mxu2 %v1215_v23  ;;  %2515 = vmatmul.msk.f32.gmra.mxu3 %vm926_vm1, %v1216_v57  ;;  %v1502_v23 = vld [vmem:[%s4424_s3 + $0x318] sm:$0xff]  ;;  %v1823_v57 = vld [vmem:[%s4424_s3 + $0x490] sm:$0xff] }
 0x1d4   :  { %v1323_v0 = vpop.f32.mrf.mxu2  ;;  %v1412_v22 = vpop.f32.mrf.mxu3 }
 0x1d5   :  { %v3641_v31 = vadd.f32 %v1412_v22, %v1323_v0  ;;  %v3643_v5 = vpop.f32.mrf.mxu0  ;;  %v3645_v6 = vpop.f32.mrf.mxu1  ;;  %v1824_v0 = vld [vmem:[%s4424_s3 + $0x498] sm:$0xff] }
 0x1d8   :  { %1075 = vmatmul.f32.gmra.mxu0 %v918_v9  ;;  %2492 = vmatmul.msk.f32.gmra.mxu1 %vm926_vm1, %v919_v10 }
 0x1d9   :  { %1373 = vmatmul.f32.gmra.mxu2 %v1217_v62  ;;  %2516 = vmatmul.msk.f32.gmra.mxu3 %vm926_vm1, %v1218_v16 }
 0x1dc   :  { %v1326_v13 = vpop.f32.mrf.mxu2  ;;  %v1415_v46 = vpop.f32.mrf.mxu3 }
 0x1dd   :  { %v3661_v41 = vadd.f32 %v1415_v46, %v1326_v13  ;;  %v3663_v14 = vpop.f32.mrf.mxu0  ;;  %v3665_v55 = vpop.f32.mrf.mxu1  ;;  %v1503_v13 = vld [vmem:[%s4424_s3 + $0x320] sm:$0xff]  ;;  %v1504_v46 = vld [vmem:[%s4424_s3 + $0x328] sm:$0xff] }
 0x1e0   :  { %1078 = vmatmul.f32.gmra.mxu0 %v920_v56  ;;  %2493 = vmatmul.msk.f32.gmra.mxu1 %vm926_vm1, %v921_v59  ;;  %v1825_v56 = vld [vmem:[%s4424_s3 + $0x4a0] sm:$0xff]  ;;  %v1826_v59 = vld [vmem:[%s4424_s3 + $0x4a8] sm:$0xff] }
 0x1e1   :  { %1376 = vmatmul.f32.gmra.mxu2 %v1219_v7  ;;  %2517 = vmatmul.msk.f32.gmra.mxu3 %vm926_vm1, %v1220_v52 }
 0x1e4   :  { %v1329_v63 = vpop.f32.mrf.mxu2  ;;  %v1418_v51 = vpop.f32.mrf.mxu3 }
 0x1e5   :  { %v3681_v50 = vadd.f32 %v1418_v51, %v1329_v63  ;;  %v3683_v4 = vpop.f32.mrf.mxu0  ;;  %v3685_v19 = vpop.f32.mrf.mxu1 }
 0x1e8   :  { %1081 = vmatmul.f32.gmra.mxu0 %v922_v20  ;;  %2494 = vmatmul.msk.f32.gmra.mxu1 %vm926_vm1, %v923_v3  ;;  %v1505_v3 = vld [vmem:[%s4424_s3 + $0x330] sm:$0xff] }
 0x1e9   :  { %1379 = vmatmul.f32.gmra.mxu2 %v1221_v53  ;;  %2518 = vmatmul.msk.f32.gmra.mxu3 %vm926_vm1, %v1222_v32  ;;  %v1506_v53 = vld [vmem:[%s4424_s3 + $0x338] sm:$0xff]  ;;  %v1827_v32 = vld [vmem:[%s4424_s3 + $0x4b0] sm:$0xff] }
 0x1ec   :  { %v1332_v28 = vpop.f32.mrf.mxu2  ;;  %v1421_v2 = vpop.f32.mrf.mxu3 }
 0x1ed   :  { %v3701_v61 = vadd.f32 %v1421_v2, %v1332_v28  ;;  %v3703_v29 = vpop.f32.mrf.mxu0  ;;  %v3705_v33 = vpop.f32.mrf.mxu1  ;;  %v1828_v28 = vld [vmem:[%s4424_s3 + $0x4b8] sm:$0xff] }
 0x1f0   :  { %1084 = vmatmul.f32.gmra.mxu0 %v924_v38  ;;  %2495 = vmatmul.msk.f32.gmra.mxu1 %vm926_vm1, %v925_v21 }
 0x1f1   :  { %1382 = vmatmul.f32.gmra.mxu2 %v1223_v45  ;;  %2519 = vmatmul.msk.f32.gmra.mxu3 %vm926_vm1, %v1224_v58 }
 0x1f4   :  { %v1335_v1 = vpop.f32.mrf.mxu2  ;;  %v1424_v26 = vpop.f32.mrf.mxu3 }
 0x1f5   :  { %v3721_v37 = vadd.f32 %v1424_v26, %v1335_v1  ;;  %v3723_v35 = vpop.f32.mrf.mxu0  ;;  %v3725_v39 = vpop.f32.mrf.mxu1  ;;  %v1507_v1 = vld [vmem:[%s4424_s3 + $0x340] sm:$0xff]  ;;  %v1508_v26 = vld [vmem:[%s4424_s3 + $0x348] sm:$0xff] }
 0x1f8   :  { %1635 = vmatmul.f32.vlgmr.msra.gmra.mxu0 %v1499_v42  ;;  %2520 = vmatmul.msk.f32.vlgmr.msra.gmra.mxu1 %vm926_vm1, %v1500_v43  ;;  %v1829_v42 = vld [vmem:[%s4424_s3 + $0x4c0] sm:$0xff]  ;;  %v1830_v43 = vld [vmem:[%s4424_s3 + $0x4c8] sm:$0xff] }
 0x1f9   :  { %1957 = vmatmul.f32.vlgmr.msra.gmra.mxu2 %v1821_v60  ;;  %2544 = vmatmul.msk.f32.vlgmr.msra.gmra.mxu3 %vm926_vm1, %v1822_v27 }
 0x1fc   :  { %v1338_v36 = vpop.f32.mrf.mxu2  ;;  %v1427_v8 = vpop.f32.mrf.mxu3 }
 0x1fd   :  { %v3741_v47 = vadd.f32 %v1427_v8, %v1338_v36  ;;  %v3743_v48 = vpop.f32.mrf.mxu0  ;;  %v3745_v12 = vpop.f32.mrf.mxu1 }
 0x200   :  { %1638 = vmatmul.f32.gmra.mxu0 %v1501_v54  ;;  %2521 = vmatmul.msk.f32.gmra.mxu1 %vm926_vm1, %v1502_v23  ;;  %v1509_v23 = vld [vmem:[%s4424_s3 + $0x350] sm:$0xff] }
 0x201   :  { %1960 = vmatmul.f32.gmra.mxu2 %v1823_v57  ;;  %2545 = vmatmul.msk.f32.gmra.mxu3 %vm926_vm1, %v1824_v0  ;;  %v1510_v57 = vld [vmem:[%s4424_s3 + $0x358] sm:$0xff]  ;;  %v1831_v0 = vld [vmem:[%s4424_s3 + $0x4d0] sm:$0xff] }
 0x204   :  { %v1341_v22 = vpop.f32.mrf.mxu2  ;;  %v1430_v9 = vpop.f32.mrf.mxu3 }
 0x205   :  { %v3761_v10 = vadd.f32 %v1430_v9, %v1341_v22  ;;  %v3763_v62 = vpop.f32.mrf.mxu0  ;;  %v3765_v16 = vpop.f32.mrf.mxu1  ;;  %v1832_v22 = vld [vmem:[%s4424_s3 + $0x4d8] sm:$0xff] }
 0x207   :  { %4487 = vst [vmem:[#allocation20_spill] sm:$0xff] %v3761_v10 }
 0x208   :  { %1641 = vmatmul.f32.gmra.mxu0 %v1503_v13  ;;  %2522 = vmatmul.msk.f32.gmra.mxu1 %vm926_vm1, %v1504_v46 }
 0x209   :  { %1963 = vmatmul.f32.gmra.mxu2 %v1825_v56  ;;  %2546 = vmatmul.msk.f32.gmra.mxu3 %vm926_vm1, %v1826_v59 }
 0x20c   :  { %v1344_v7 = vpop.f32.mrf.mxu2  ;;  %v1433_v52 = vpop.f32.mrf.mxu3 }
 0x20d   :  { %v3781_v63 = vadd.f32 %v1433_v52, %v1344_v7  ;;  %v3783_v51 = vpop.f32.mrf.mxu0  ;;  %v3785_v20 = vpop.f32.mrf.mxu1  ;;  %v1511_v7 = vld [vmem:[%s4424_s3 + $0x360] sm:$0xff]  ;;  %v1512_v52 = vld [vmem:[%s4424_s3 + $0x368] sm:$0xff] }
 0x210   :  { %1644 = vmatmul.f32.gmra.mxu0 %v1505_v3  ;;  %2523 = vmatmul.msk.f32.gmra.mxu1 %vm926_vm1, %v1506_v53  ;;  %v1833_v3 = vld [vmem:[%s4424_s3 + $0x4e0] sm:$0xff]  ;;  %v1834_v53 = vld [vmem:[%s4424_s3 + $0x4e8] sm:$0xff] }
 0x211   :  { %1966 = vmatmul.f32.gmra.mxu2 %v1827_v32  ;;  %2547 = vmatmul.msk.f32.gmra.mxu3 %vm926_vm1, %v1828_v28 }
 0x214   :  { %v1347_v2 = vpop.f32.mrf.mxu2  ;;  %v1436_v38 = vpop.f32.mrf.mxu3 }
 0x215   :  { %v3801_v21 = vadd.f32 %v1436_v38, %v1347_v2  ;;  %v3803_v45 = vpop.f32.mrf.mxu0  ;;  %v3805_v58 = vpop.f32.mrf.mxu1 }
 0x218   :  { %1647 = vmatmul.f32.gmra.mxu0 %v1507_v1  ;;  %2524 = vmatmul.msk.f32.gmra.mxu1 %vm926_vm1, %v1508_v26  ;;  %v1513_v26 = vld [vmem:[%s4424_s3 + $0x370] sm:$0xff] }
 0x219   :  { %1969 = vmatmul.f32.gmra.mxu2 %v1829_v42  ;;  %2548 = vmatmul.msk.f32.gmra.mxu3 %vm926_vm1, %v1830_v43  ;;  %v1514_v42 = vld [vmem:[%s4424_s3 + $0x378] sm:$0xff]  ;;  %v1835_v43 = vld [vmem:[%s4424_s3 + $0x4f0] sm:$0xff] }
 0x21c   :  { %v1350_v60 = vpop.f32.mrf.mxu2  ;;  %v1439_v27 = vpop.f32.mrf.mxu3 }
 0x21d   :  { %v3821_v36 = vadd.f32 %v1439_v27, %v1350_v60  ;;  %v3823_v8 = vpop.f32.mrf.mxu0  ;;  %v3825_v54 = vpop.f32.mrf.mxu1  ;;  %v1836_v60 = vld [vmem:[%s4424_s3 + $0x4f8] sm:$0xff] }
 0x220   :  { %1650 = vmatmul.f32.gmra.mxu0 %v1509_v23  ;;  %2525 = vmatmul.msk.f32.gmra.mxu1 %vm926_vm1, %v1510_v57 }
 0x221   :  { %1972 = vmatmul.f32.gmra.mxu2 %v1831_v0  ;;  %2549 = vmatmul.msk.f32.gmra.mxu3 %vm926_vm1, %v1832_v22 }
 0x224   :  { %v1353_v9 = vpop.f32.mrf.mxu2  ;;  %v1442_v13 = vpop.f32.mrf.mxu3 }
 0x225   :  { %v3841_v46 = vadd.f32 %v1442_v13, %v1353_v9  ;;  %v3843_v56 = vpop.f32.mrf.mxu0  ;;  %v3845_v59 = vpop.f32.mrf.mxu1  ;;  %v1515_v9 = vld [vmem:[%s4424_s3 + $0x380] sm:$0xff]  ;;  %v1516_v13 = vld [vmem:[%s4424_s3 + $0x388] sm:$0xff] }
 0x228   :  { %1653 = vmatmul.f32.gmra.mxu0 %v1511_v7  ;;  %2526 = vmatmul.msk.f32.gmra.mxu1 %vm926_vm1, %v1512_v52  ;;  %v1837_v7 = vld [vmem:[%s4424_s3 + $0x500] sm:$0xff]  ;;  %v1838_v52 = vld [vmem:[%s4424_s3 + $0x508] sm:$0xff] }
 0x229   :  { %1975 = vmatmul.f32.gmra.mxu2 %v1833_v3  ;;  %2550 = vmatmul.msk.f32.gmra.mxu3 %vm926_vm1, %v1834_v53 }
 0x22c   :  { %v1356_v32 = vpop.f32.mrf.mxu2  ;;  %v1445_v28 = vpop.f32.mrf.mxu3 }
 0x22d   :  { %v3861_v2 = vadd.f32 %v1445_v28, %v1356_v32  ;;  %v3863_v38 = vpop.f32.mrf.mxu0  ;;  %v3865_v1 = vpop.f32.mrf.mxu1 }
 0x230   :  { %1656 = vmatmul.f32.gmra.mxu0 %v1513_v26  ;;  %2527 = vmatmul.msk.f32.gmra.mxu1 %vm926_vm1, %v1514_v42  ;;  %v1517_v42 = vld [vmem:[%s4424_s3 + $0x390] sm:$0xff] }
 0x231   :  { %1978 = vmatmul.f32.gmra.mxu2 %v1835_v43  ;;  %2551 = vmatmul.msk.f32.gmra.mxu3 %vm926_vm1, %v1836_v60  ;;  %v1518_v43 = vld [vmem:[%s4424_s3 + $0x398] sm:$0xff]  ;;  %v1839_v60 = vld [vmem:[%s4424_s3 + $0x510] sm:$0xff] }
 0x234   :  { %v1359_v27 = vpop.f32.mrf.mxu2  ;;  %v1448_v23 = vpop.f32.mrf.mxu3 }
 0x235   :  { %v3881_v57 = vadd.f32 %v1448_v23, %v1359_v27  ;;  %v3883_v0 = vpop.f32.mrf.mxu0  ;;  %v3885_v22 = vpop.f32.mrf.mxu1  ;;  %v1840_v27 = vld [vmem:[%s4424_s3 + $0x518] sm:$0xff] }
 0x238   :  { %1659 = vmatmul.f32.gmra.mxu0 %v1515_v9  ;;  %2528 = vmatmul.msk.f32.gmra.mxu1 %vm926_vm1, %v1516_v13 }
 0x239   :  { %1981 = vmatmul.f32.gmra.mxu2 %v1837_v7  ;;  %2552 = vmatmul.msk.f32.gmra.mxu3 %vm926_vm1, %v1838_v52 }
 0x23c   :  { %v1362_v3 = vpop.f32.mrf.mxu2  ;;  %v1451_v53 = vpop.f32.mrf.mxu3 }
 0x23d   :  { %v3901_v32 = vadd.f32 %v1451_v53, %v1362_v3  ;;  %v3903_v28 = vpop.f32.mrf.mxu0  ;;  %v3905_v26 = vpop.f32.mrf.mxu1  ;;  %v1519_v3 = vld [vmem:[%s4424_s3 + $0x3a0] sm:$0xff]  ;;  %v1520_v53 = vld [vmem:[%s4424_s3 + $0x3a8] sm:$0xff] }
 0x23e   :  { %4488 = vst [vmem:[#allocation21_spill] sm:$0xff] %v3903_v28 }
 0x23f   :  { %4489 = vst [vmem:[#allocation11_spill] sm:$0xff] %v3905_v26  ;;  %v1521_v26 = vld [vmem:[%s4424_s3 + $0x3b0] sm:$0xff] }
 0x240   :  { %1662 = vmatmul.f32.gmra.mxu0 %v1517_v42  ;;  %2529 = vmatmul.msk.f32.gmra.mxu1 %vm926_vm1, %v1518_v43  ;;  %v1841_v42 = vld [vmem:[%s4424_s3 + $0x520] sm:$0xff]  ;;  %v1842_v43 = vld [vmem:[%s4424_s3 + $0x528] sm:$0xff] }
 0x241   :  { %1984 = vmatmul.f32.gmra.mxu2 %v1839_v60  ;;  %2553 = vmatmul.msk.f32.gmra.mxu3 %vm926_vm1, %v1840_v27 }
 0x244   :  { %v1365_v23 = vpop.f32.mrf.mxu2  ;;  %v1454_v9 = vpop.f32.mrf.mxu3 }
 0x245   :  { %v3921_v13 = vadd.f32 %v1454_v9, %v1365_v23  ;;  %v3923_v7 = vpop.f32.mrf.mxu0  ;;  %v3925_v52 = vpop.f32.mrf.mxu1 }
 0x246   :  { %4491 = vst [vmem:[#allocation16_spill] sm:$0xff] %v3923_v7 }
 0x247   :  { %4490 = vst [vmem:[#allocation10_spill] sm:$0xff] %v3921_v13 }
 0x248   :  { %4492 = vst [vmem:[#allocation19_spill] sm:$0xff] %v3925_v52  ;;  %1665 = vmatmul.f32.gmra.mxu0 %v1519_v3  ;;  %2530 = vmatmul.msk.f32.gmra.mxu1 %vm926_vm1, %v1520_v53  ;;  %v1522_v3 = vld [vmem:[%s4424_s3 + $0x3b8] sm:$0xff]  ;;  %v1843_v53 = vld [vmem:[%s4424_s3 + $0x530] sm:$0xff]  ;;  %v1523_v52 = vld [vmem:[%s4424_s3 + $0x3c0] sm:$0xff] }
 0x249   :  { %1987 = vmatmul.f32.gmra.mxu2 %v1841_v42  ;;  %2554 = vmatmul.msk.f32.gmra.mxu3 %vm926_vm1, %v1842_v43  ;;  %v1844_v42 = vld [vmem:[%s4424_s3 + $0x538] sm:$0xff] }
 0x24c   :  { %v1368_v60 = vpop.f32.mrf.mxu2  ;;  %v1457_v27 = vpop.f32.mrf.mxu3 }
 0x24d   :  { %v3941_v23 = vadd.f32 %v1457_v27, %v1368_v60  ;;  %v3943_v9 = vpop.f32.mrf.mxu0  ;;  %v3945_v13 = vpop.f32.mrf.mxu1 }
 0x24e   :  { %4494 = vst [vmem:[#allocation18_spill] sm:$0xff] %v3943_v9 }
 0x24f   :  { %4493 = vst [vmem:[#allocation14_spill] sm:$0xff] %v3941_v23 }
 0x250   :  { %4495 = vst [vmem:[#allocation7_spill] sm:$0xff] %v3945_v13  ;;  %1668 = vmatmul.f32.gmra.mxu0 %v1521_v26  ;;  %2531 = vmatmul.msk.f32.gmra.mxu1 %vm926_vm1, %v1522_v3  ;;  %v1524_v26 = vld [vmem:[%s4424_s3 + $0x3c8] sm:$0xff]  ;;  %v1845_v3 = vld [vmem:[%s4424_s3 + $0x540] sm:$0xff]  ;;  %v1525_v13 = vld [vmem:[%s4424_s3 + $0x3d0] sm:$0xff] }
 0x251   :  { %1990 = vmatmul.f32.gmra.mxu2 %v1843_v53  ;;  %2555 = vmatmul.msk.f32.gmra.mxu3 %vm926_vm1, %v1844_v42  ;;  %v1846_v53 = vld [vmem:[%s4424_s3 + $0x548] sm:$0xff] }
 0x254   :  { %v1371_v43 = vpop.f32.mrf.mxu2  ;;  %v1460_v60 = vpop.f32.mrf.mxu3 }
 0x255   :  { %v3961_v27 = vadd.f32 %v1460_v60, %v1371_v43  ;;  %v3963_v23 = vpop.f32.mrf.mxu0  ;;  %v3965_v28 = vpop.f32.mrf.mxu1 }
 0x256   :  { %4497 = vst [vmem:[#allocation12_spill] sm:$0xff] %v3963_v23 }
 0x257   :  { %4496 = vst [vmem:[#allocation6_spill] sm:$0xff] %v3961_v27 }
 0x258   :  { %4498 = vst [vmem:[#allocation17_spill] sm:$0xff] %v3965_v28  ;;  %1671 = vmatmul.f32.gmra.mxu0 %v1523_v52  ;;  %2532 = vmatmul.msk.f32.gmra.mxu1 %vm926_vm1, %v1524_v26  ;;  %v1526_v52 = vld [vmem:[%s4424_s3 + $0x3d8] sm:$0xff]  ;;  %v1847_v26 = vld [vmem:[%s4424_s3 + $0x550] sm:$0xff]  ;;  %v1527_v28 = vld [vmem:[%s4424_s3 + $0x3e0] sm:$0xff] }
 0x259   :  { %1993 = vmatmul.f32.gmra.mxu2 %v1845_v3  ;;  %2556 = vmatmul.msk.f32.gmra.mxu3 %vm926_vm1, %v1846_v53  ;;  %v1848_v3 = vld [vmem:[%s4424_s3 + $0x558] sm:$0xff] }
 0x25c   :  { %v1374_v42 = vpop.f32.mrf.mxu2  ;;  %v1463_v43 = vpop.f32.mrf.mxu3 }
 0x25d   :  { %v3981_v60 = vadd.f32 %v1463_v43, %v1374_v42  ;;  %v3983_v27 = vpop.f32.mrf.mxu0  ;;  %v3985_v7 = vpop.f32.mrf.mxu1 }
 0x25e   :  { %4500 = vst [vmem:[#allocation3_spill] sm:$0xff] %v3983_v27  ;;  %v1532_v27 = vld [vmem:[%s4424_s3 + $0x408] sm:$0xff] }
 0x25f   :  { %4499 = vst [vmem:[#allocation22_spill] sm:$0xff] %v3981_v60 }
 0x260   :  { %4501 = vst [vmem:[#allocation2_spill] sm:$0xff] %v3985_v7  ;;  %1674 = vmatmul.f32.gmra.mxu0 %v1525_v13  ;;  %2533 = vmatmul.msk.f32.gmra.mxu1 %vm926_vm1, %v1526_v52  ;;  %v1528_v13 = vld [vmem:[%s4424_s3 + $0x3e8] sm:$0xff]  ;;  %v1849_v52 = vld [vmem:[%s4424_s3 + $0x560] sm:$0xff]  ;;  %v1529_v7 = vld [vmem:[%s4424_s3 + $0x3f0] sm:$0xff] }
 0x261   :  { %1996 = vmatmul.f32.gmra.mxu2 %v1847_v26  ;;  %2557 = vmatmul.msk.f32.gmra.mxu3 %vm926_vm1, %v1848_v3  ;;  %v1850_v26 = vld [vmem:[%s4424_s3 + $0x568] sm:$0xff] }
 0x264   :  { %v1377_v53 = vpop.f32.mrf.mxu2  ;;  %v1466_v42 = vpop.f32.mrf.mxu3 }
 0x265   :  { %v4001_v43 = vadd.f32 %v1466_v42, %v1377_v53  ;;  %v4003_v60 = vpop.f32.mrf.mxu0  ;;  %v4005_v9 = vpop.f32.mrf.mxu1 }
 0x266   :  { %4503 = vst [vmem:[#allocation8_spill] sm:$0xff] %v4003_v60 }
 0x267   :  { %4502 = vst [vmem:[#allocation15_spill] sm:$0xff] %v4001_v43 }
 0x268   :  { %4504 = vst [vmem:[#allocation13_spill] sm:$0xff] %v4005_v9  ;;  %1677 = vmatmul.f32.gmra.mxu0 %v1527_v28  ;;  %2534 = vmatmul.msk.f32.gmra.mxu1 %vm926_vm1, %v1528_v13  ;;  %v1530_v28 = vld [vmem:[%s4424_s3 + $0x3f8] sm:$0xff]  ;;  %v1851_v13 = vld [vmem:[%s4424_s3 + $0x570] sm:$0xff] }
 0x269   :  { %1999 = vmatmul.f32.gmra.mxu2 %v1849_v52  ;;  %2558 = vmatmul.msk.f32.gmra.mxu3 %vm926_vm1, %v1850_v26  ;;  %v1852_v52 = vld [vmem:[%s4424_s3 + $0x578] sm:$0xff] }
 0x26c   :  { %v1380_v3 = vpop.f32.mrf.mxu2  ;;  %v1469_v53 = vpop.f32.mrf.mxu3 }
 0x26d   :  { %v4021_v42 = vadd.f32 %v1469_v53, %v1380_v3  ;;  %v4023_v43 = vpop.f32.mrf.mxu0  ;;  %v4025_v23 = vpop.f32.mrf.mxu1 }
 0x26e   :  { %4506 = vst [vmem:[#allocation9_spill] sm:$0xff] %v4023_v43  ;;  %v1531_v43 = vld [vmem:[%s4424_s3 + $0x400] sm:$0xff] }
 0x26f   :  { %4505 = vst [vmem:[#allocation4_spill] sm:$0xff] %v4021_v42 }
 0x270   :  { %4507 = vst [vmem:[#allocation5_spill] sm:$0xff] %v4025_v23  ;;  %1680 = vmatmul.f32.gmra.mxu0 %v1529_v7  ;;  %2535 = vmatmul.msk.f32.gmra.mxu1 %vm926_vm1, %v1530_v28  ;;  %v1853_v7 = vld [vmem:[%s4424_s3 + $0x580] sm:$0xff]  ;;  %v1854_v28 = vld [vmem:[%s4424_s3 + $0x588] sm:$0xff] }
 0x271   :  { %2002 = vmatmul.f32.gmra.mxu2 %v1851_v13  ;;  %2559 = vmatmul.msk.f32.gmra.mxu3 %vm926_vm1, %v1852_v52  ;;  %v1106_v13 = vadd.f32 %v3565_v30, %v3563_v24  ;;  %v1533_v24 = vld [vmem:[%s4424_s3 + $0x410] sm:$0xff]  ;;  %v1534_v30 = vld [vmem:[%s4424_s3 + $0x418] sm:$0xff] }
 0x274   :  { %v1383_v26 = vpop.f32.mrf.mxu2  ;;  %v1472_v3 = vpop.f32.mrf.mxu3 }
 0x275   :  { %v4041_v53 = vadd.f32 %v1472_v3, %v1383_v26  ;;  %v1636_v42 = vpop.f32.mrf.mxu0  ;;  %v1725_v23 = vpop.f32.mrf.mxu1  ;;  %v1475_v26 = vmax.f32 %v1106_v13, %v3581_v15  ;;  %v1109_v3 = vadd.f32 %v3585_v25, %v3583_v34  ;;  %v1855_v34 = vld [vmem:[%s4424_s3 + $0x590] sm:$0xff]  ;;  %v1856_v25 = vld [vmem:[%s4424_s3 + $0x598] sm:$0xff] }
 0x276   :  { %v1726_v52 = vadd.f32 %v1725_v23, %v1636_v42 }
 0x277   :  { %4508 = vst [vmem:[#allocation23_spill] sm:$0xff] %v4041_v53  ;;  %v1476_v15 = vmax.f32 %v1109_v3, %v3601_v40  ;;  %v1112_v40 = vadd.f32 %v3605_v18, %v3603_v17  ;;  %v1536_v3 = vld [vmem:[%s4424_s3 + $0x428] sm:$0xff]  ;;  %v1857_v17 = vld [vmem:[%s4424_s3 + $0x5a0] sm:$0xff] }
 0x278   :  { %1683 = vmatmul.f32.gmra.mxu0 %v1531_v43  ;;  %2536 = vmatmul.msk.f32.gmra.mxu1 %vm926_vm1, %v1532_v27  ;;  %v4062_v60 = vmax.f32 %v1475_v26, %v1726_v52  ;;  %v1535_v26 = vld [vmem:[%s4424_s3 + $0x420] sm:$0xff]  ;;  %v1858_v18 = vld [vmem:[%s4424_s3 + $0x5a8] sm:$0xff] }
 0x279   :  { %2005 = vmatmul.f32.gmra.mxu2 %v1853_v7  ;;  %2560 = vmatmul.msk.f32.gmra.mxu3 %vm926_vm1, %v1854_v28 }
 0x27a   :  { %4509 = vst [vmem:[#allocation24_spill] sm:$0xff] %v4062_v60 }
 0x27c   :  { %v1958_v53 = vpop.f32.mrf.mxu2  ;;  %v2047_v9 = vpop.f32.mrf.mxu3 }
 0x27d   :  { %v4064_v10 = vadd.f32 %v2047_v9, %v1958_v53  ;;  %v1639_v43 = vpop.f32.mrf.mxu0  ;;  %v1728_v27 = vpop.f32.mrf.mxu1 }
 0x27e   :  { %v1729_v23 = vadd.f32 %v1728_v27, %v1639_v43  ;;  %v1477_v43 = vmax.f32 %v1112_v40, %v3621_v44  ;;  %v1115_v44 = vadd.f32 %v3625_v11, %v3623_v49  ;;  %v1859_v49 = vld [vmem:[%s4424_s3 + $0x5b0] sm:$0xff]  ;;  %v1860_v11 = vld [vmem:[%s4424_s3 + $0x5b8] sm:$0xff] }
 0x27f   :  { %4510 = vst [vmem:[#allocation25_spill] sm:$0xff] %v4064_v10 }
 0x280   :  { %v4081_v42 = vmax.f32 %v1476_v15, %v1729_v23  ;;  %1686 = vmatmul.f32.gmra.mxu0 %v1533_v24  ;;  %2537 = vmatmul.msk.f32.gmra.mxu1 %vm926_vm1, %v1534_v30 }
 0x281   :  { %2008 = vmatmul.f32.gmra.mxu2 %v1855_v34  ;;  %2561 = vmatmul.msk.f32.gmra.mxu3 %vm926_vm1, %v1856_v25 }
 0x282   :  { %4511 = vst [vmem:[#allocation26_spill] sm:$0xff] %v4081_v42 }
 0x284   :  { %v1961_v53 = vpop.f32.mrf.mxu2  ;;  %v2050_v7 = vpop.f32.mrf.mxu3 }
 0x285   :  { %v4087_v28 = vadd.f32 %v2050_v7, %v1961_v53  ;;  %v1642_v13 = vpop.f32.mrf.mxu0  ;;  %v1731_v52 = vpop.f32.mrf.mxu1  ;;  %v1537_v53 = vld [vmem:[%s4424_s3 + $0x430] sm:$0xff]  ;;  %v1538_v7 = vld [vmem:[%s4424_s3 + $0x438] sm:$0xff] }
 0x286   :  { %v1732_v27 = vadd.f32 %v1731_v52, %v1642_v13  ;;  %v1478_v13 = vmax.f32 %v1115_v44, %v3641_v31  ;;  %v1118_v31 = vadd.f32 %v3645_v6, %v3643_v5  ;;  %v1861_v5 = vld [vmem:[%s4424_s3 + $0x5c0] sm:$0xff]  ;;  %v1862_v6 = vld [vmem:[%s4424_s3 + $0x5c8] sm:$0xff] }
 0x287   :  { %4512 = vst [vmem:[#allocation27_spill] sm:$0xff] %v4087_v28 }
 0x288   :  { %v4104_v30 = vmax.f32 %v1477_v43, %v1732_v27  ;;  %1689 = vmatmul.f32.gmra.mxu0 %v1535_v26  ;;  %2538 = vmatmul.msk.f32.gmra.mxu1 %vm926_vm1, %v1536_v3 }
 0x289   :  { %2011 = vmatmul.f32.gmra.mxu2 %v1857_v17  ;;  %2562 = vmatmul.msk.f32.gmra.mxu3 %vm926_vm1, %v1858_v18 }
 0x28a   :  { %4513 = vst [vmem:[#allocation28_spill] sm:$0xff] %v4104_v30 }
 0x28c   :  { %v1964_v15 = vpop.f32.mrf.mxu2  ;;  %v2053_v23 = vpop.f32.mrf.mxu3 }
 0x28d   :  { %v4110_v34 = vadd.f32 %v2053_v23, %v1964_v15  ;;  %v1645_v25 = vpop.f32.mrf.mxu0  ;;  %v1734_v40 = vpop.f32.mrf.mxu1  ;;  %v1539_v15 = vld [vmem:[%s4424_s3 + $0x440] sm:$0xff]  ;;  %v1540_v23 = vld [vmem:[%s4424_s3 + $0x448] sm:$0xff] }
 0x28e   :  { %v1735_v52 = vadd.f32 %v1734_v40, %v1645_v25  ;;  %v1479_v25 = vmax.f32 %v1118_v31, %v3661_v41  ;;  %v1121_v41 = vadd.f32 %v3665_v55, %v3663_v14  ;;  %v1863_v14 = vld [vmem:[%s4424_s3 + $0x5d0] sm:$0xff]  ;;  %v1864_v55 = vld [vmem:[%s4424_s3 + $0x5d8] sm:$0xff] }
 0x28f   :  { %4514 = vst [vmem:[#allocation29_spill] sm:$0xff] %v4110_v34 }
 0x290   :  { %v4127_v3 = vmax.f32 %v1478_v13, %v1735_v52  ;;  %1692 = vmatmul.f32.gmra.mxu0 %v1537_v53  ;;  %2539 = vmatmul.msk.f32.gmra.mxu1 %vm926_vm1, %v1538_v7  ;;  %v4258_v53 = vpop.permute.xlu1 %2234 }
 0x291   :  { %2014 = vmatmul.f32.gmra.mxu2 %v1859_v49  ;;  %2563 = vmatmul.msk.f32.gmra.mxu3 %vm926_vm1, %v1860_v11 }
 0x292   :  { %4515 = vst [vmem:[#allocation30_spill] sm:$0xff] %v4127_v3 }
 0x294   :  { %v1967_v43 = vpop.f32.mrf.mxu2  ;;  %v2056_v27 = vpop.f32.mrf.mxu3 }
 0x295   :  { %v4133_v17 = vadd.f32 %v2056_v27, %v1967_v43  ;;  %v1648_v18 = vpop.f32.mrf.mxu0  ;;  %v1737_v44 = vpop.f32.mrf.mxu1  ;;  %v1541_v43 = vld [vmem:[%s4424_s3 + $0x450] sm:$0xff]  ;;  %v1542_v27 = vld [vmem:[%s4424_s3 + $0x458] sm:$0xff] }
 0x296   :  { %v1738_v40 = vadd.f32 %v1737_v44, %v1648_v18  ;;  %v1480_v18 = vmax.f32 %v1121_v41, %v3681_v50  ;;  %v1124_v50 = vadd.f32 %v3685_v19, %v3683_v4  ;;  %v1865_v4 = vld [vmem:[%s4424_s3 + $0x5e0] sm:$0xff]  ;;  %v1866_v19 = vld [vmem:[%s4424_s3 + $0x5e8] sm:$0xff] }
 0x297   :  { %4516 = vst [vmem:[#allocation31_spill] sm:$0xff] %v4133_v17 }
 0x298   :  { %v4150_v7 = vmax.f32 %v1479_v25, %v1738_v40  ;;  %1695 = vmatmul.f32.gmra.mxu0 %v1539_v15  ;;  %2540 = vmatmul.msk.f32.gmra.mxu1 %vm926_vm1, %v1540_v23  ;;  %v4264_v30 = vpop.permute.xlu1 %2219 }
 0x299   :  { %2017 = vmatmul.f32.gmra.mxu2 %v1861_v5  ;;  %2564 = vmatmul.msk.f32.gmra.mxu3 %vm926_vm1, %v1862_v6  ;;  %4528 = vst [vmem:[#allocation43_spill] sm:$0xff] %v4264_v30 }
 0x29a   :  { %4517 = vst [vmem:[#allocation32_spill] sm:$0xff] %v4150_v7 }
 0x29c   :  { %v1970_v13 = vpop.f32.mrf.mxu2  ;;  %v2059_v52 = vpop.f32.mrf.mxu3 }
 0x29d   :  { %v4156_v49 = vadd.f32 %v2059_v52, %v1970_v13  ;;  %v1651_v11 = vpop.f32.mrf.mxu0  ;;  %v1740_v31 = vpop.f32.mrf.mxu1  ;;  %v1543_v13 = vld [vmem:[%s4424_s3 + $0x460] sm:$0xff]  ;;  %v1544_v52 = vld [vmem:[%s4424_s3 + $0x468] sm:$0xff] }
 0x29e   :  { %v1741_v44 = vadd.f32 %v1740_v31, %v1651_v11  ;;  %v1481_v11 = vmax.f32 %v1124_v50, %v3701_v61  ;;  %v1127_v61 = vadd.f32 %v3705_v33, %v3703_v29  ;;  %v1867_v29 = vld [vmem:[%s4424_s3 + $0x5f0] sm:$0xff]  ;;  %v1868_v33 = vld [vmem:[%s4424_s3 + $0x5f8] sm:$0xff] }
 0x29f   :  { %4518 = vst [vmem:[#allocation33_spill] sm:$0xff] %v4156_v49 }
 0x2a0   :  { %v4173_v23 = vmax.f32 %v1480_v18, %v1741_v44  ;;  %1698 = vmatmul.f32.gmra.mxu0 %v1541_v43  ;;  %2541 = vmatmul.msk.f32.gmra.mxu1 %vm926_vm1, %v1542_v27 }
 0x2a1   :  { %2020 = vmatmul.f32.gmra.mxu2 %v1863_v14  ;;  %2565 = vmatmul.msk.f32.gmra.mxu3 %vm926_vm1, %v1864_v55 }
 0x2a2   :  { %4519 = vst [vmem:[#allocation34_spill] sm:$0xff] %v4173_v23 }
 0x2a4   :  { %v1973_v25 = vpop.f32.mrf.mxu2  ;;  %v2062_v40 = vpop.f32.mrf.mxu3 }
 0x2a5   :  { %v4179_v5 = vadd.f32 %v2062_v40, %v1973_v25  ;;  %v1654_v6 = vpop.f32.mrf.mxu0  ;;  %v1743_v41 = vpop.f32.mrf.mxu1  ;;  %v1545_v25 = vld [vmem:[%s4424_s3 + $0x470] sm:$0xff]  ;;  %v1546_v40 = vld [vmem:[%s4424_s3 + $0x478] sm:$0xff] }
 0x2a6   :  { %v1744_v31 = vadd.f32 %v1743_v41, %v1654_v6  ;;  %v1482_v6 = vmax.f32 %v1127_v61, %v3721_v37  ;;  %v1130_v37 = vadd.f32 %v3725_v39, %v3723_v35 }
 0x2a7   :  { %4520 = vst [vmem:[#allocation35_spill] sm:$0xff] %v4179_v5 }
 0x2a8   :  { %v4196_v27 = vmax.f32 %v1481_v11, %v1744_v31  ;;  %1701 = vmatmul.f32.gmra.mxu0 %v1543_v13  ;;  %2542 = vmatmul.msk.f32.gmra.mxu1 %vm926_vm1, %v1544_v52 }
 0x2a9   :  { %2023 = vmatmul.f32.gmra.mxu2 %v1865_v4  ;;  %2566 = vmatmul.msk.f32.gmra.mxu3 %vm926_vm1, %v1866_v19 }
 0x2aa   :  { %4521 = vst [vmem:[#allocation36_spill] sm:$0xff] %v4196_v27 }
 0x2ac   :  { %v1976_v18 = vpop.f32.mrf.mxu2  ;;  %v2065_v44 = vpop.f32.mrf.mxu3 }
 0x2ad   :  { %v4202_v14 = vadd.f32 %v2065_v44, %v1976_v18  ;;  %v1657_v55 = vpop.f32.mrf.mxu0  ;;  %v1746_v50 = vpop.f32.mrf.mxu1  ;;  %v1483_v18 = vmax.f32 %v1130_v37, %v3741_v47 }
 0x2ae   :  { %v1747_v41 = vadd.f32 %v1746_v50, %v1657_v55 }
 0x2af   :  { %4522 = vst [vmem:[#allocation37_spill] sm:$0xff] %v4202_v14  ;;  %v1148_v14 = vadd.f32 %v3845_v59, %v3843_v56  ;;  %v1136_v56 = vadd.f32 %v3765_v16, %v3763_v62  ;;  %v1139_v59 = vadd.f32 %v3785_v20, %v3783_v51  ;;  %v1154_v62 = vadd.f32 %v3885_v22, %v3883_v0 }
 0x2b0   :  { %v4219_v52 = vmax.f32 %v1482_v6, %v1747_v41  ;;  %1704 = vmatmul.f32.gmra.mxu0 %v1545_v25  ;;  %2543 = vmatmul.msk.f32.gmra.mxu1 %vm926_vm1, %v1546_v40 }
 0x2b1   :  { %2026 = vmatmul.f32.gmra.mxu2 %v1867_v29  ;;  %2567 = vmatmul.msk.f32.gmra.mxu3 %vm926_vm1, %v1868_v33 }
 0x2b2   :  { %4523 = vst [vmem:[#allocation38_spill] sm:$0xff] %v4219_v52  ;;  %v1145_v52 = vadd.f32 %v3825_v54, %v3823_v8 }
 0x2b4   :  { %v1979_v11 = vpop.f32.mrf.mxu2  ;;  %v2068_v31 = vpop.f32.mrf.mxu3 }
 0x2b5   :  { %v4225_v4 = vadd.f32 %v2068_v31, %v1979_v11  ;;  %v1660_v19 = vpop.f32.mrf.mxu0  ;;  %v1749_v61 = vpop.f32.mrf.mxu1 }
 0x2b6   :  { %v1750_v44 = vadd.f32 %v1749_v61, %v1660_v19  ;;  %v4248_v11 = vpop.permute.xlu2 %2244 }
 0x2b7   :  { %4524 = vst [vmem:[#allocation39_spill] sm:$0xff] %v4225_v4  ;;  %v1133_v4 = vadd.f32 %v3745_v12, %v3743_v48  ;;  %v1142_v48 = vadd.f32 %v3805_v58, %v3803_v45  ;;  %v1488_v12 = vmax.f32 %v1145_v52, %v3841_v46 }
 0x2b8   :  { %v4230_v50 = vmax.f32 %v1483_v18, %v1750_v44  ;;  %v4254_v44 = vpop.permute.xlu0 %2239 }
 0x2ba   :  { %4525 = vst [vmem:[#allocation40_spill] sm:$0xff] %v4230_v50 }
 0x2bc   :  { %v1982_v25 = vpop.f32.mrf.mxu2  ;;  %v2071_v40 = vpop.f32.mrf.mxu3 }
 0x2bd   :  { %v4232_v6 = vadd.f32 %v2071_v40, %v1982_v25  ;;  %v4234_v41 = vpop.f32.mrf.mxu0  ;;  %v4236_v35 = vpop.f32.mrf.mxu1 }
 0x2be   :  { %v4256_v25 = vpop.permute.xlu2 %2229 }
 0x2bf   :  { %4526 = vst [vmem:[#allocation41_spill] sm:$0xff] %v4232_v6  ;;  %v1151_v6 = vadd.f32 %v3865_v1, %v3863_v38 }
 0x2c0   :  { %v4260_v39 = vpop.permute.xlu0 %2224 }
 0x2c4   :  { %v4240_v29 = vpop.f32.mrf.mxu2  ;;  %v4242_v47 = vpop.f32.mrf.mxu3 }
 0x2c5   :  { %v4244_v33 = vpop.f32.mrf.mxu0  ;;  %v4246_v37 = vpop.f32.mrf.mxu1 }
 0x2c6   :  { %v4262_v10 = vpop.permute.xlu2 %2214 }
 0x2c7   :  { %4527 = vst [vmem:[#allocation42_spill] sm:$0xff] %v4262_v10 }
 0x2c8   :  { %v4266_v17 = vpop.permute.xlu0 %2209 }
 0x2c9   :  { %4529 = vst [vmem:[#allocation44_spill] sm:$0xff] %v4266_v17  ;;  %v4278_v17 = vpop.permute.xlu1 %2204 }
 0x2cc   :  { %v4250_v31 = vpop.f32.mrf.mxu2  ;;  %v4252_v19 = vpop.f32.mrf.mxu3 }
 0x2cd   :  { %v1669_v61 = vpop.f32.mrf.mxu0  ;;  %v1758_v18 = vpop.f32.mrf.mxu1 }
 0x2ce   :  { %v4268_v3 = vpop.permute.xlu2 %2199  ;;  %v1759_v16 = vadd.f32 %v1758_v18, %v1669_v61 }
 0x2cf   :  { %4530 = vst [vmem:[#allocation45_spill] sm:$0xff] %v4268_v3  ;;  %v1489_v3 = vmax.f32 %v1148_v14, %v3861_v2  ;;  %v1490_v2 = vmax.f32 %v1151_v6, %v3881_v57  ;;  %v1486_v57 = vmax.f32 %v1139_v59, %v3801_v21  ;;  %v4532_v59 = vld [vmem:[#allocation43_spill] sm:$0xff] }
 0x2d0   :  { %v4288_v8 = vpop.permute.xlu0 %2284 }
 0x2d1   :  { %v1808_v21 = vmax.f32 %v1486_v57, %v1759_v16  ;;  %v4534_v16 = vld [vmem:[#allocation40_spill] sm:$0xff] }
 0x2d4   :  { %v1991_v40 = vpop.f32.mrf.mxu2  ;;  %v2080_v9 = vpop.f32.mrf.mxu3 }
 0x2d5   :  { %v1672_v24 = vpop.f32.mrf.mxu0  ;;  %v1761_v26 = vpop.f32.mrf.mxu1 }
 0x2d6   :  { %v4290_v54 = vpop.permute.xlu2 %2279  ;;  %v1762_v38 = vadd.f32 %v1761_v26, %v1672_v24  ;;  %v2081_v24 = vadd.f32 %v2080_v9, %v1991_v40  ;;  %v4531_v9 = vld [vmem:[#allocation20_spill] sm:$0xff] }
 0x2d7   :  { %v1484_v14 = vmax.f32 %v1133_v4, %v4531_v9 }
 0x2dc   :  { %v1994_v15 = vpop.f32.mrf.mxu2  ;;  %v2083_v43 = vpop.f32.mrf.mxu3 }
 0x2dd   :  { %v1675_v13 = vpop.f32.mrf.mxu0  ;;  %v1764_v55 = vpop.f32.mrf.mxu1  ;;  %v2084_v51 = vadd.f32 %v2083_v43, %v1994_v15 }
 0x2de   :  { %v1765_v50 = vadd.f32 %v1764_v55, %v1675_v13  ;;  %v2075_v13 = vadd.f32 %v4242_v47, %v4240_v29  ;;  %v2130_v55 = vmax.f32 %v1808_v21, %v2081_v24  ;;  %v2190_v47 = vpop.permute.xlu0 %2189  ;;  %v2185_v61 = vpop.permute.xlu2 %2184  ;;  %v4542_v24 = vld [vmem:[#allocation37_spill] sm:$0xff] }
 0x2e0   :  { %v1810_v58 = vmax.f32 %v1488_v12, %v1765_v50  ;;  %v2298_v40 = vadd.f32 %v4260_v39, %v2130_v55  ;;  %v4535_v39 = vld [vmem:[#allocation41_spill] sm:$0xff] }
 0x2e2   :  { %v2322_v12 = vmax.f32 %v2298_v40, 0.0 }
 0x2e4   :  { %v1997_v60 = vpop.f32.mrf.mxu2  ;;  %v2086_v28 = vpop.f32.mrf.mxu3 }
 0x2e5   :  { %v1678_v42 = vpop.f32.mrf.mxu0  ;;  %v1767_v34 = vpop.f32.mrf.mxu1  ;;  %v2087_v1 = vadd.f32 %v2086_v28, %v1997_v60  ;;  %v1491_v60 = vmax.f32 %v1154_v62, %v3901_v32 }
 0x2e6   :  { %v1768_v27 = vadd.f32 %v1767_v34, %v1678_v42  ;;  %v1487_v34 = vmax.f32 %v1142_v48, %v3821_v36  ;;  %v1756_v36 = vadd.f32 %v4246_v37, %v4244_v33  ;;  %v4343_v57 = vpop.permute.xlu0 %2269 }
 0x2e7   :  { %v2132_v22 = vmax.f32 %v1810_v58, %v2087_v1 }
 0x2e8   :  { %v1811_v42 = vmax.f32 %v1489_v3, %v1768_v27  ;;  %v1809_v0 = vmax.f32 %v1487_v34, %v1762_v38  ;;  %v1485_v3 = vmax.f32 %v1136_v56, %v3781_v63  ;;  %v2195_v63 = vpop.permute.xlu1 %2194 }
 0x2e9   :  { %v2300_v6 = vadd.f32 %v4258_v53, %v2132_v22  ;;  %v4544_v22 = vld [vmem:[#allocation45_spill] sm:$0xff] }
 0x2ea   :  { %v2131_v32 = vmax.f32 %v1809_v0, %v2084_v51  ;;  %v1807_v52 = vmax.f32 %v1485_v3, %v1756_v36  ;;  %v4536_v51 = vmax.f32 %v4534_v16, %v4535_v39 }
 0x2ec   :  { %v2000_v49 = vpop.f32.mrf.mxu2  ;;  %v2089_v7 = vpop.f32.mrf.mxu3  ;;  %v2299_v29 = vadd.f32 %v4256_v25, %v2131_v32 }
 0x2ed   :  { %v1681_v5 = vpop.f32.mrf.mxu0  ;;  %v1770_v23 = vpop.f32.mrf.mxu1  ;;  %v2090_v10 = vadd.f32 %v2089_v7, %v2000_v49 }
 0x2ee   :  { %v1771_v30 = vadd.f32 %v1770_v23, %v1681_v5  ;;  %v2323_v56 = vmax.f32 %v2299_v29, 0.0  ;;  %v4554_v29 = vld [vmem:[#allocation28_spill] sm:$0xff] }
 0x2ef   :  { %v2133_v46 = vmax.f32 %v1811_v42, %v2090_v10  ;;  %v1753_v10 = vadd.f32 %v4236_v35, %v4234_v41 }
 0x2f0   :  { %v1812_v7 = vmax.f32 %v1490_v2, %v1771_v30  ;;  %v2078_v30 = vadd.f32 %v4252_v19, %v4250_v31  ;;  %v4533_v2 = vld [vmem:[#allocation42_spill] sm:$0xff]  ;;  %v4337_v58 = vpop.permute.xlu1 %2274 }
 0x2f1   :  { %v2301_v27 = vadd.f32 %v4254_v44, %v2133_v46  ;;  %v1806_v41 = vmax.f32 %v1484_v14, %v1753_v10  ;;  %v2324_v44 = vmax.f32 %v2300_v6, 0.0  ;;  %v4545_v10 = vld [vmem:[#allocation34_spill] sm:$0xff] }
 0x2f2   :  { %v2129_v37 = vmax.f32 %v1807_v52, %v2078_v30  ;;  %v4546_v30 = vld [vmem:[#allocation35_spill] sm:$0xff]  ;;  %v4549_v52 = vld [vmem:[#allocation33_spill] sm:$0xff] }
 0x2f3   :  { %v2325_v4 = vmax.f32 %v2301_v27, 0.0  ;;  %v2128_v18 = vmax.f32 %v1806_v41, %v2075_v13  ;;  %v4547_v21 = vmax.f32 %v4545_v10, %v4546_v30  ;;  %v4548_v13 = vld [vmem:[#allocation32_spill] sm:$0xff]  ;;  %v4551_v41 = vld [vmem:[#allocation30_spill] sm:$0xff] }
 0x2f4   :  { %v2003_v20 = vpop.f32.mrf.mxu2  ;;  %v2092_v45 = vpop.f32.mrf.mxu3  ;;  %v2297_v48 = vadd.f32 %v4532_v59, %v2129_v37  ;;  %v4550_v55 = vmax.f32 %v4548_v13, %v4549_v52  ;;  %v4563_v13 = vld [vmem:[#allocation8_spill] sm:$0xff]  ;;  %v4564_v52 = vld [vmem:[#allocation13_spill] sm:$0xff] }
 0x2f5   :  { %v2093_v49 = vadd.f32 %v2092_v45, %v2003_v20  ;;  %v1684_v23 = vpop.f32.mrf.mxu0  ;;  %v1773_v5 = vpop.f32.mrf.mxu1  ;;  %v2296_v38 = vadd.f32 %v4533_v2, %v2128_v18  ;;  %v4537_v20 = vld [vmem:[#allocation44_spill] sm:$0xff]  ;;  %v2292_v32 = vadd.f32 %v2195_v63, %v4547_v21  ;;  %v4555_v18 = vld [vmem:[#allocation29_spill] sm:$0xff]  ;;  %v4558_v2 = vld [vmem:[#allocation27_spill] sm:$0xff] }
 0x2f6   :  { %v1774_v28 = vadd.f32 %v1773_v5, %v1684_v23  ;;  %v2321_v62 = vmax.f32 %v2297_v48, 0.0  ;;  %v2295_v45 = vadd.f32 %v4537_v20, %v4536_v51  ;;  %v4560_v20 = vld [vmem:[#allocation24_spill] sm:$0xff] }
 0x2f7   :  { %v2134_v26 = vmax.f32 %v1812_v7, %v2093_v49  ;;  %v2320_v46 = vmax.f32 %v2296_v38, 0.0  ;;  %v4538_v7 = vld [vmem:[#allocation38_spill] sm:$0xff]  ;;  %v4539_v49 = vld [vmem:[#allocation39_spill] sm:$0xff]  ;;  %v2316_v6 = vmax.f32 %v2292_v32, 0.0 }
 0x2f8   :  { %v4305_v15 = vmax.f32 %v1491_v60, %v1774_v28  ;;  %v4540_v23 = vmax.f32 %v4538_v7, %v4539_v49  ;;  %v4345_v60 = vpop.permute.xlu2 %2264  ;;  %v2319_v36 = vmax.f32 %v2295_v45, 0.0  ;;  %v4541_v28 = vld [vmem:[#allocation36_spill] sm:$0xff]  ;;  %v4561_v45 = vld [vmem:[#allocation25_spill] sm:$0xff] }
 0x2f9   :  { %v2302_v43 = vadd.f32 %v4248_v11, %v2134_v26  ;;  %v4543_v0 = vmax.f32 %v4541_v28, %v4542_v24 }
 0x2fa   :  { %v2294_v5 = vadd.f32 %v4278_v17, %v4540_v23 }
 0x2fb   :  { %v2326_v50 = vmax.f32 %v2302_v43, 0.0  ;;  %v2293_v26 = vadd.f32 %v4544_v22, %v4543_v0 }
 0x2fc   :  { %v2006_v35 = vpop.f32.mrf.mxu2  ;;  %v2095_v33 = vpop.f32.mrf.mxu3  ;;  %v2318_v3 = vmax.f32 %v2294_v5, 0.0  ;;  %v2335_v5 = vld [vmem:[%s4425_s5] sm:$0xff] }
 0x2fd   :  { %v4313_v31 = vadd.f32 %v2095_v33, %v2006_v35  ;;  %2347 = vmatpush.msrb.mxu0 %v2326_v50  ;;  %v4315_v11 = vpop.f32.mrf.mxu0  ;;  %v4317_v19 = vpop.f32.mrf.mxu1  ;;  %v2317_v14 = vmax.f32 %v2293_v26, 0.0  ;;  %v2291_v50 = vadd.f32 %v2190_v47, %v4550_v55  ;;  %v4552_v35 = vld [vmem:[#allocation31_spill] sm:$0xff]  ;;  %v1172_v55 = vadd.f32 %v4564_v52, %v4563_v13  ;;  %v4577_v13 = vld [vmem:[#allocation16_spill] sm:$0xff] }
 0x2fe   :  { %v4553_v33 = vmax.f32 %v4551_v41, %v4552_v35  ;;  %v4566_v41 = vld [vmem:[#allocation2_spill] sm:$0xff]  ;;  %v4578_v52 = vld [vmem:[#allocation19_spill] sm:$0xff] }
 0x2ff   :  { %v2135_v53 = vmax.f32 %v4305_v15, %v4313_v31  ;;  %2348 = vmatpush.msrb.mxu0 %v2325_v4  ;;  %v2180_v4 = vpop.permute.xlu1 %2179  ;;  %v2315_v63 = vmax.f32 %v2291_v50, 0.0 }
 0x300   :  { %v2290_v37 = vadd.f32 %v2185_v61, %v4553_v33  ;;  %v2170_v59 = vpop.permute.xlu2 %2169  ;;  %v4567_v33 = vld [vmem:[#allocation9_spill] sm:$0xff] }
 0x301   :  { %2349 = vmatpush.msrb.mxu0 %v2324_v44  ;;  %v4556_v44 = vmax.f32 %v4554_v29, %v4555_v18 }
 0x302   :  { %v2314_v48 = vmax.f32 %v2290_v37, 0.0  ;;  %v4568_v37 = vld [vmem:[#allocation5_spill] sm:$0xff] }
 0x303   :  { %2350 = vmatpush.msrb.mxu0 %v2323_v56  ;;  %v2289_v40 = vadd.f32 %v2180_v4, %v4556_v44  ;;  %v2175_v56 = vpop.permute.xlu0 %2174  ;;  %v1175_v4 = vadd.f32 %v4568_v37, %v4567_v33  ;;  %v1777_v33 = vadd.f32 %v4317_v19, %v4315_v11 }
 0x304   :  { %v4325_v1 = vpop.f32.mrf.mxu2  ;;  %v4327_v25 = vpop.f32.mrf.mxu3 }
 0x305   :  { %2351 = vmatpush.msrb.mxu0 %v2322_v12  ;;  %v4329_v42 = vpop.f32.mrf.mxu0  ;;  %v4331_v34 = vpop.f32.mrf.mxu1  ;;  %v4557_v12 = vld [vmem:[#allocation26_spill] sm:$0xff]  ;;  %v2313_v51 = vmax.f32 %v2289_v40, 0.0 }
 0x306   :  { %v4559_v47 = vmax.f32 %v4557_v12, %v4558_v2  ;;  %v4572_v12 = vld [vmem:[#allocation15_spill] sm:$0xff] }
 0x307   :  { %2352 = vmatpush.msrb.mxu0 %v2321_v62 }
 0x308   :  { %v2288_v38 = vadd.f32 %v2175_v56, %v4559_v47  ;;  %v4570_v56 = vld [vmem:[#allocation12_spill] sm:$0xff]  ;;  %v4573_v47 = vld [vmem:[#allocation23_spill] sm:$0xff] }
 0x309   :  { %2353 = vmatpush.msrb.mxu0 %v2320_v46  ;;  %v4562_v46 = vmax.f32 %v4560_v20, %v4561_v45 }
 0x30a   :  { %v2312_v49 = vmax.f32 %v2288_v38, 0.0  ;;  %v1498_v38 = vmax.f32 %v1175_v4, %v4573_v47 }
 0x30b   :  { %2354 = vmatpush.msrb.mxu0 %v2319_v36  ;;  %v2287_v7 = vadd.f32 %v2170_v59, %v4562_v46  ;;  %v4571_v59 = vld [vmem:[#allocation17_spill] sm:$0xff]  ;;  %v4574_v46 = vld [vmem:[#allocation18_spill] sm:$0xff] }
 0x30c   :  { %v4354_v43 = vpop.f32.mrf.mxu2  ;;  %v4356_v17 = vpop.f32.mrf.mxu3 }
 0x30d   :  { %2355 = vmatpush.msrb.mxu0 %v2318_v3  ;;  %v1693_v27 = vpop.f32.mrf.mxu0  ;;  %v1782_v9 = vpop.f32.mrf.mxu1  ;;  %v2311_v23 = vmax.f32 %v2287_v7, 0.0  ;;  %v4575_v7 = vld [vmem:[#allocation7_spill] sm:$0xff]  ;;  %v2102_v37 = vadd.f32 %v4356_v17, %v4354_v43 }
 0x30f   :  { %2356 = vmatpush.msrb.mxu0 %v2317_v14 }
 0x311   :  { %2357 = vmatpush.msrb.mxu0 %v2316_v6  ;;  %v4565_v6 = vld [vmem:[#allocation3_spill] sm:$0xff] }
 0x312   :  { %v1169_v35 = vadd.f32 %v4566_v41, %v4565_v6  ;;  %v4579_v6 = vld [vmem:[#allocation6_spill] sm:$0xff] }
 0x313   :  { %2358 = vmatpush.msrb.mxu0 %v2315_v63  ;;  %v4569_v63 = vld [vmem:[#allocation4_spill] sm:$0xff] }
 0x314   :  { %v2015_v62 = vpop.f32.mrf.mxu2  ;;  %v2104_v16 = vpop.f32.mrf.mxu3  ;;  %v1497_v29 = vmax.f32 %v1172_v55, %v4569_v63  ;;  %v1496_v2 = vmax.f32 %v1169_v35, %v4572_v12  ;;  %v1160_v55 = vadd.f32 %v4578_v52, %v4577_v13 }
 0x315   :  { %2359 = vmatpush.msrb.mxu0 %v2314_v48  ;;  %v1696_v39 = vpop.f32.mrf.mxu0  ;;  %v1785_v61 = vpop.f32.mrf.mxu1  ;;  %v1166_v48 = vadd.f32 %v4571_v59, %v4570_v56 }
 0x317   :  { %2360 = vmatpush.msrb.mxu0 %v2313_v51  ;;  %v1786_v51 = vadd.f32 %v1785_v61, %v1696_v39  ;;  %v1780_v61 = vadd.f32 %v4331_v34, %v4329_v42  ;;  %v2260_v34 = vpop.permute.xlu1 %2259 }
 0x319   :  { %2361 = vmatpush.msrb.mxu0 %v2312_v49  ;;  %v1163_v49 = vadd.f32 %v4575_v7, %v4574_v46  ;;  %v2341_v46 = vpop.permute.xlu2 %2340 }
 0x31b   :  { %2362 = vmatpush.msrb.mxu0 %v2311_v23  ;;  %v4576_v23 = vld [vmem:[#allocation22_spill] sm:$0xff]  ;;  %v1494_v39 = vmax.f32 %v1163_v49, %v4579_v6 }
 0x31c   :  { %v2018_v36 = vpop.f32.mrf.mxu2  ;;  %v2107_v28 = vpop.f32.mrf.mxu3  ;;  %2363 = vmatmul.f32.vlgmr.msrb.gmra.mxu0 %v2335_v5  ;;  %v1495_v5 = vmax.f32 %v1166_v48, %v4576_v23 }
 0x31d   :  { %v1699_v24 = vpop.f32.mrf.mxu0  ;;  %v1788_v0 = vpop.f32.mrf.mxu1 }
 0x31e   :  { %v1789_v18 = vadd.f32 %v1788_v0, %v1699_v24 }
 0x324   :  { %v2021_v22 = vpop.f32.mrf.mxu2  ;;  %v2110_v26 = vpop.f32.mrf.mxu3 }
 0x325   :  { %v1702_v3 = vpop.f32.mrf.mxu0  ;;  %v1791_v10 = vpop.f32.mrf.mxu1  ;;  %v2111_v20 = vadd.f32 %v2110_v26, %v2021_v22  ;;  %v2105_v22 = vadd.f32 %v2104_v16, %v2015_v62  ;;  %v1817_v26 = vmax.f32 %v1495_v5, %v1786_v51  ;;  %v4583_v62 = vld [vmem:[#allocation10_spill] sm:$0xff] }
 0x326   :  { %v1792_v50 = vadd.f32 %v1791_v10, %v1702_v3  ;;  %v1783_v3 = vadd.f32 %v1782_v9, %v1693_v27  ;;  %v2108_v10 = vadd.f32 %v2107_v28, %v2018_v36  ;;  %v4580_v27 = vld [vmem:[#allocation21_spill] sm:$0xff]  ;;  %v4581_v9 = vld [vmem:[#allocation11_spill] sm:$0xff]  ;;  %v4582_v28 = vld [vmem:[#allocation14_spill] sm:$0xff] }
 0x327   :  { %v1157_v36 = vadd.f32 %v4581_v9, %v4580_v27  ;;  %v1493_v35 = vmax.f32 %v1160_v55, %v4582_v28 }
 0x328   :  { %v1819_v45 = vmax.f32 %v1497_v29, %v1792_v50  ;;  %v1816_v4 = vmax.f32 %v1494_v39, %v1783_v3  ;;  %v2139_v63 = vmax.f32 %v1817_v26, %v2108_v10 }
 0x329   :  { %v1492_v16 = vmax.f32 %v1157_v36, %v4583_v62 }
 0x32a   :  { %v2307_v17 = vadd.f32 %v4343_v57, %v2139_v63 }
 0x32b   :  { %v1814_v19 = vmax.f32 %v1492_v16, %v1777_v33 }
 0x32c   :  { %v2024_v30 = vpop.f32.mrf.mxu2  ;;  %v2113_v21 = vpop.f32.mrf.mxu3  ;;  %v2331_v12 = vmax.f32 %v2307_v17, 0.0 }
 0x32d   :  { %v1705_v32 = vpop.f32.mrf.mxu0  ;;  %v1794_v14 = vpop.f32.mrf.mxu1  ;;  %v2114_v44 = vadd.f32 %v2113_v21, %v2024_v30  ;;  %v1818_v30 = vmax.f32 %v1496_v2, %v1789_v18  ;;  %v2099_v18 = vadd.f32 %v4327_v25, %v4325_v1 }
 0x32e   :  { %v1795_v40 = vadd.f32 %v1794_v14, %v1705_v32  ;;  %v2255_v1 = vpop.permute.xlu0 %2254 }
 0x32f   :  { %v2141_v21 = vmax.f32 %v1819_v45, %v2114_v44  ;;  %v2140_v50 = vmax.f32 %v1818_v30, %v2111_v20  ;;  %v1815_v44 = vmax.f32 %v1493_v35, %v1780_v61 }
 0x330   :  { %v1820_v32 = vmax.f32 %v1498_v38, %v1795_v40  ;;  %v2138_v40 = vmax.f32 %v1816_v4, %v2105_v22  ;;  %v2250_v38 = vpop.permute.xlu1 %2249 }
 0x331   :  { %v2309_v42 = vadd.f32 %v4290_v54, %v2141_v21  ;;  %v2308_v11 = vadd.f32 %v4337_v58, %v2140_v50  ;;  %v2137_v59 = vmax.f32 %v1815_v44, %v2102_v37  ;;  %v2303_v51 = vadd.f32 %v2250_v38, %v2135_v53 }
 0x332   :  { %v2306_v48 = vadd.f32 %v4345_v60, %v2138_v40  ;;  %v2336_v60 = vld [vmem:[%s4425_s5 + $0x8] sm:$0xff] }
 0x333   :  { %v2333_v43 = vmax.f32 %v2309_v42, 0.0  ;;  %v2332_v54 = vmax.f32 %v2308_v11, 0.0  ;;  %v2305_v2 = vadd.f32 %v2260_v34, %v2137_v59  ;;  %v2327_v20 = vmax.f32 %v2303_v51, 0.0 }
 0x334   :  { %v2027_v24 = vpop.f32.mrf.mxu2  ;;  %v2116_v0 = vpop.f32.mrf.mxu3  ;;  %v2330_v25 = vmax.f32 %v2306_v48, 0.0 }
 0x335   :  { %v2117_v14 = vadd.f32 %v2116_v0, %v2027_v24  ;;  %v2329_v58 = vmax.f32 %v2305_v2, 0.0 }
 0x337   :  { %v2142_v41 = vmax.f32 %v1820_v32, %v2117_v14 }
 0x339   :  { %v2310_v29 = vadd.f32 %v4288_v8, %v2142_v41  ;;  %v2136_v8 = vmax.f32 %v1814_v19, %v2099_v18 }
 0x33b   :  { %v2334_v56 = vmax.f32 %v2310_v29, 0.0  ;;  %v2304_v47 = vadd.f32 %v2255_v1, %v2136_v8 }
 0x33d   :  { %2375 = vmatpush.msrb.mxu1 %v2334_v56  ;;  %v2328_v57 = vmax.f32 %v2304_v47, 0.0 }
 0x33f   :  { %2376 = vmatpush.msrb.mxu1 %v2333_v43 }
 0x341   :  { %2377 = vmatpush.msrb.mxu1 %v2332_v54 }
 0x343   :  { %2378 = vmatpush.msrb.mxu1 %v2331_v12 }
 0x345   :  { %2379 = vmatpush.msrb.mxu1 %v2330_v25 }
 0x347   :  { %2380 = vmatpush.msrb.mxu1 %v2329_v58 }
 0x349   :  { %2381 = vmatpush.msrb.mxu1 %v2328_v57 }
 0x34b   :  { %2382 = vmatpush.msrb.mxu1 %v2327_v20 }
 0x34c   :  { %2568 = vmatmul.msk.f32.vlgmr.msrb.gmra.mxu1 %vm2343_vm2, %v2336_v60 }
 0x399   :  { %v2364_v45 = vpop.f32.mrf.mxu0 }
 0x39a   :  { %v2365_v7 = vadd.f32 %v2364_v45, %v2341_v46 }
 0x3c9   :  { %v2384_v49 = vpop.f32.mrf.mxu1 }
 0x3ca   :  { %v2385_v23 = vadd.f32 %v2384_v49, %v2365_v7 }
 0x3cc   :  { %2387 = vst [vmem:[%s4426_s7] sm:$0xff] %v2385_v23 }

</bundles_post_ra>
